<compile_context>
chip_gen: v5e
topology: v5e:2x2
jax: 0.10.0
libtpu: 0.0.40
codegen_flags: <defaults>
</compile_context>

<pallas_src>
import jax
import jax.numpy as jnp
from jax.experimental import pallas as pl
from jax.experimental.pallas import tpu as pltpu


def _make_e5_kernel(*, b_tile: int, c_s: int, n_chunks: int, hidden: int):
    """Fused kernel: DMA-gather embeddings -> tanh(x@W+b) -> S-sum -> /count -> L2 norm."""
    rows = b_tile * c_s

    def kernel(ids_ref,    # [B,S] int32 in SMEM (scalar prefetch)
               emb_hbm,    # [V,H] f32, memory_space=pl.ANY (HBM)
               cnt_ref,    # [b_tile,1] f32, clamp(sum_mask,1)
               w_ref,      # [H,H] bf16, VMEM resident
               b_ref,      # [1,H] f32
               o_ref,      # [b_tile,H] f32 output (also the S accumulator)
               emb_buf,    # VMEM (2, b_tile, c_s, H) f32 gather double-buffer
               sem):       # DMA semaphores, shape (2,) -- one per buffer slot
        i = pl.program_id(0)

        def start_gather(chunk, slot):
            s_base = chunk * c_s

            @pl.loop(0, b_tile)
            def _(bl):
                @pl.loop(0, c_s)
                def _(sl):
                    tok = ids_ref[i * b_tile + bl, s_base + sl]
                    pltpu.make_async_copy(
                        emb_hbm.at[tok],
                        emb_buf.at[slot, bl, sl],
                        sem.at[slot],
                    ).start()

        def wait_gather(slot):
            # All row copies are identical (H,) f32 slabs onto sem[slot]; wait once per row.
            # The descriptor refs only supply the per-copy size for the semaphore wait.
            @pl.loop(0, rows)
            def _(r):
                pltpu.make_async_copy(
                    emb_hbm.at[0], emb_buf.at[slot, 0, 0], sem.at[slot]
                ).wait()

        # Init accumulator and prime the first chunk's gather.
        o_ref[...] = jnp.zeros_like(o_ref)
        start_gather(0, 0)

        @pl.loop(0, n_chunks)
        def _(c):
            slot = c % 2
            wait_gather(slot)

            # Prefetch next chunk into the other slot while computing this one.
            @pl.when(c + 1 < n_chunks)
            def _():
                start_gather(c + 1, 1 - slot)

            # MXU: bf16 x bf16 -> f32; bias + tanh in f32 (EUP/VPU), partial S-sum.
            x = emb_buf[slot].reshape(rows, hidden).astype(jnp.bfloat16)
            h = jnp.dot(x, w_ref[...], preferred_element_type=jnp.float32)
            h = jnp.tanh(h + b_ref[...])
            o_ref[...] += h.reshape(b_tile, c_s, hidden).sum(axis=1)

        # Finalize: mean over valid tokens, then exact L2 normalization.
        inv_cnt = pl.reciprocal(cnt_ref[...], approx=True)   # positive scale cancels below
        pooled = o_ref[...] * inv_cnt
        norm = jnp.sqrt(jnp.sum(pooled * pooled, axis=1, keepdims=True))
        o_ref[...] = pooled / jnp.maximum(norm, 1e-12)

    return kernel


class E5ModelSimplifiedPallas:
    """Pallas equivalent of E5ModelSimplifiedWrapper with a synthetic backbone."""

    def __init__(self, vocab_size: int, hidden: int, key):
        # H must be lane-dense; in production keep it a multiple of 256 for the
        # v6e/v7x 256x256 MXU (E5 base H=1024 already is).
        assert hidden % 128 == 0, "keep H a multiple of 128 (256 preferred on v6e/v7x)"
        k1, k2, k3 = jax.random.split(key, 3)
        # f32 table (see TODO about u32-packed bf16 gather); W cast to bf16 once.
        self.embedding = 0.02 * jax.random.normal(k1, (vocab_size, hidden), jnp.float32)
        self.w = (0.02 * jax.random.normal(k2, (hidden, hidden), jnp.float32)).astype(jnp.bfloat16)
        self.b = 0.02 * jax.random.normal(k3, (1, hidden), jnp.float32)

    def __call__(self, input_ids, attention_mask, *, b_tile=None, c_s=None):
        B, S = input_ids.shape
        assert attention_mask.shape == (B, S)
        H = self.embedding.shape[1]

        # Tile defaults: b_tile multiple of 8 with >=2 B-tiles (megacore / v7x wants an
        # even B-tile count); c_s <= 128 tokens per in-kernel chunk bounds the f32
        # [b_tile*c_s, H] intermediate and the gather buffer.
        if b_tile is None:
            b_tile = next((c for c in (32, 16, 8) if B % c == 0 and B // c >= 2), B)
        if c_s is None:
            c_s = next((c for c in (128, 64, 32, 16, 8) if S % c == 0), S)
        assert B % b_tile == 0 and S % c_s == 0
        assert b_tile == B or b_tile % 8 == 0, "b_tile must be 8-aligned (or == B)"
        assert c_s % 8 == 0, "c_s must be a multiple of the f32 sublane tile (8)"
        n_chunks = S // c_s
        rows = b_tile * c_s

        ids = input_ids.astype(jnp.int32)
        # Precompute clamp(sum_mask, 1) on the host/XLA side -> [B,1] f32.
        counts = jnp.maximum(
            jnp.sum(attention_mask, axis=1, keepdims=True).astype(jnp.float32), 1.0)

        # VMEM working-set estimate -> explicit limit; cap at 56 MiB so it is portable to
        # v7x (64 MiB); on v6e/v5e this may be raised toward 96 MiB with larger tiles.
        est = (2 * rows * H * 4       # gather double buffer (f32)
               + 2 * H * H * 2        # resident bf16 W (pipeline double buffer)
               + rows * H * 4         # f32 matmul/tanh intermediate
               + rows * H * 2         # bf16 MXU LHS
               + 2 * b_tile * H * 4   # output block
               + 64 * 1024)
        vmem_limit = int(min(max(2 * est, 32 * 1024 * 1024), 56 * 1024 * 1024))

        kernel = _make_e5_kernel(b_tile=b_tile, c_s=c_s, n_chunks=n_chunks, hidden=H)

        out = pl.pallas_call(
            kernel,
            out_shape=jax.ShapeDtypeStruct((B, H), jnp.float32),
            grid_spec=pltpu.PrefetchScalarGridSpec(
                num_scalar_prefetch=1,                       # input_ids -> SMEM
                grid=(B // b_tile,),
                in_specs=[
                    pl.BlockSpec(memory_space=pl.ANY),                  # embedding table (HBM)
                    pl.BlockSpec((b_tile, 1), lambda i, ids: (i, 0)),   # clamped counts
                    pl.BlockSpec((H, H), lambda i, ids: (0, 0)),        # W (resident)
                    pl.BlockSpec((1, H), lambda i, ids: (0, 0)),        # bias (resident)
                ],
                out_specs=pl.BlockSpec((b_tile, H), lambda i, ids: (i, 0)),
                scratch_shapes=[
                    pltpu.VMEM((2, b_tile, c_s, H), jnp.float32),       # gather double buffer
                    pltpu.SemaphoreType.DMA((2,)),                      # one sem per slot
                ],
            ),
            compiler_params=pltpu.CompilerParams(
                dimension_semantics=("parallel",),           # B-tiles shard across TCs
                vmem_limit_bytes=vmem_limit,
            ),
        )(ids, self.embedding, counts, self.w, self.b)
        return out


def _reference(model: E5ModelSimplifiedPallas, input_ids, attention_mask):
    """Pure-JAX reference mirroring the PyTorch wrapper semantics (same dtypes as kernel)."""
    emb = jnp.take(model.embedding, input_ids, axis=0).astype(jnp.bfloat16)   # [B,S,H]
    hidden = jnp.tanh(
        jnp.einsum("bsh,hk->bsk", emb, model.w, preferred_element_type=jnp.float32)
        + model.b)
    sum_emb = jnp.sum(hidden, axis=1)
    sum_mask = jnp.sum(attention_mask, axis=1, keepdims=True).astype(jnp.float32)
    pooled = sum_emb / jnp.maximum(sum_mask, 1.0)
    norm = jnp.sqrt(jnp.sum(pooled * pooled, axis=1, keepdims=True))
    return pooled / jnp.maximum(norm, 1e-12)


if __name__ == "__main__":
    # Small but hardware-friendly shapes: H multiple of 256, b_tile=8 with 2 B-tiles,
    # c_s=16 giving 4 S-chunks so the gather double-buffering path is exercised.
    B, S, H, V = 16, 64, 256, 512
    key = jax.random.PRNGKey(0)
    k_param, k_ids, k_len = jax.random.split(key, 3)

    model = E5ModelSimplifiedPallas(vocab_size=V, hidden=H, key=k_param)

    input_ids = jax.random.randint(k_ids, (B, S), 0, V, dtype=jnp.int32)
    lengths = jax.random.randint(k_len, (B,), 1, S + 1, dtype=jnp.int32)
    attention_mask = (jnp.arange(S)[None, :] < lengths[:, None]).astype(jnp.int32)

    out = model(input_ids, attention_mask, b_tile=8, c_s=16)
    out = jax.block_until_ready(out)

    ref = _reference(model, input_ids, attention_mask)
    assert out.shape == (B, H)
    max_err = float(jnp.max(jnp.abs(out - ref)))
    assert jnp.allclose(out, ref, atol=1e-4, rtol=1e-4), max_err

    print("KERNEL_OK")
</pallas_src>

<mosaic_0001>
module attributes {stable_mosaic.version = 11 : i64} {
  func.func @kernel(%arg0: i32, %arg1: memref<16x64xi32, #tpu.memory_space<smem>>, %arg2: memref<512x256xf32, #tpu.memory_space<any>>, %arg3: memref<8x1xf32, #tpu.memory_space<vmem>>, %arg4: memref<256x256xbf16, #tpu.memory_space<vmem>>, %arg5: memref<1x256xf32, #tpu.memory_space<vmem>>, %arg6: memref<8x256xf32, #tpu.memory_space<vmem>>, %arg7: memref<2x8x16x256xf32, #tpu.memory_space<vmem>>, %arg8: memref<2x!tpu.dma_semaphore, #tpu.memory_space<semaphore_mem>>) attributes {dimension_semantics = [#tpu.dimension_semantics<parallel>], iteration_bounds = array<i64: 2>, scalar_prefetch = 1 : i64, scratch_operands = 2 : i64, tpu.core_type = #tpu.core_type<tc>, window_params = [{}, {transform_indices = @transform_1, window_bounds = array<i64: 8, 1>}, {pipeline_mode = #tpu.pipeline_mode<synchronous>, transform_indices = @transform_2, window_bounds = array<i64: 256, 256>}, {pipeline_mode = #tpu.pipeline_mode<synchronous>, transform_indices = @transform_3, window_bounds = array<i64: 1, 256>}, {transform_indices = @transform_4, window_bounds = array<i64: 8, 256>}]} {
    %cst = arith.constant 0.000000e+00 : f32
    %0 = vector.broadcast %cst : f32 to vector<8x256xf32>
    %c0 = arith.constant 0 : index
    %c0_0 = arith.constant 0 : index
    %1 = vector.load %arg6[%c0, %c0_0] : memref<8x256xf32, #tpu.memory_space<vmem>>, vector<8x256xf32>
    tpu.vector_store %arg6[%c0, %c0_0], %0 {strides = array<i32>} : memref<8x256xf32, #tpu.memory_space<vmem>>, vector<8x256xf32>,
    %c0_i32 = arith.constant 0 : i32
    %c8_i32 = arith.constant 8 : i32
    %2 = arith.addi %c0_i32, %c8_i32 : i32
    %c1_i32 = arith.constant 1 : i32
    scf.for %arg9 = %c0_i32 to %2 step %c1_i32  : i32 {
      %c1_i32_13 = arith.constant 1 : i32
      %18 = arith.muli %arg9, %c1_i32_13 : i32
      %c0_i32_14 = arith.constant 0 : i32
      %19 = arith.addi %c0_i32_14, %18 : i32
      %c0_i32_15 = arith.constant 0 : i32
      %c16_i32 = arith.constant 16 : i32
      %20 = arith.addi %c0_i32_15, %c16_i32 : i32
      %c1_i32_16 = arith.constant 1 : i32
      scf.for %arg10 = %c0_i32_15 to %20 step %c1_i32_16  : i32 {
        %c1_i32_18 = arith.constant 1 : i32
        %21 = arith.muli %arg10, %c1_i32_18 : i32
        %c0_i32_19 = arith.constant 0 : i32
        %22 = arith.addi %c0_i32_19, %21 : i32
        %c8_i32_20 = arith.constant 8 : i32
        %23 = arith.muli %arg0, %c8_i32_20 : i32
        %24 = arith.addi %23, %19 : i32
        %c0_i32_21 = arith.constant 0 : i32
        %25 = arith.addi %c0_i32_21, %22 : i32
        %26 = arith.index_cast %24 : i32 to index
        %27 = arith.index_cast %25 : i32 to index
        %28 = memref.load %arg1[%26, %27] : memref<16x64xi32, #tpu.memory_space<smem>>
        %c0_i32_22 = arith.constant 0 : i32
        %c0_i32_23 = arith.constant 0 : i32
        %c0_i32_24 = arith.constant 0 : i32
        %29 = tpu.memref_slice %arg2[%28, %c0_i32_24] : memref<512x256xf32, #tpu.memory_space<any>> -> memref<1x256xf32, #tpu.memory_space<any>>
        %30 = tpu.memref_squeeze %29 : memref<1x256xf32, #tpu.memory_space<any>> -> memref<256xf32, #tpu.memory_space<any>>
        %c0_i32_25 = arith.constant 0 : i32
        %31 = tpu.memref_slice %arg7[%c0_i32_22, %19, %22, %c0_i32_25] : memref<2x8x16x256xf32, #tpu.memory_space<vmem>> -> memref<1x1x1x256xf32, #tpu.memory_space<vmem>>
        %32 = tpu.memref_squeeze %31 : memref<1x1x1x256xf32, #tpu.memory_space<vmem>> -> memref<256xf32, #tpu.memory_space<vmem>>
        %33 = tpu.memref_slice %arg8[%c0_i32_23] : memref<2x!tpu.dma_semaphore, #tpu.memory_space<semaphore_mem>> -> memref<1x!tpu.dma_semaphore, #tpu.memory_space<semaphore_mem>>
        %34 = tpu.memref_squeeze %33 : memref<1x!tpu.dma_semaphore, #tpu.memory_space<semaphore_mem>> -> memref<!tpu.dma_semaphore, #tpu.memory_space<semaphore_mem>>
        tpu.enqueue_dma source(%30 : memref<256xf32, #tpu.memory_space<any>>) target(%32 : memref<256xf32, #tpu.memory_space<vmem>>) target_semaphore(%34 : memref<!tpu.dma_semaphore, #tpu.memory_space<semaphore_mem>>)
      }
      %c16_i32_17 = arith.constant 16 : i32
    }
    %c8_i32_1 = arith.constant 8 : i32
    %c0_i32_2 = arith.constant 0 : i32
    %c4_i32 = arith.constant 4 : i32
    %3 = arith.addi %c0_i32_2, %c4_i32 : i32
    %c1_i32_3 = arith.constant 1 : i32
    scf.for %arg9 = %c0_i32_2 to %3 step %c1_i32_3  : i32 {
      %c1_i32_13 = arith.constant 1 : i32
      %18 = arith.muli %arg9, %c1_i32_13 : i32
      %c0_i32_14 = arith.constant 0 : i32
      %19 = arith.addi %c0_i32_14, %18 : i32
      %c2_i32 = arith.constant 2 : i32
      %c0_i32_15 = arith.constant 0 : i32
      %20 = arith.cmpi eq, %c2_i32, %c0_i32_15 : i32
      %c1_i32_16 = arith.constant 1 : i32
      %21 = arith.select %20, %c1_i32_16, %c2_i32 : i32
      %22 = arith.remsi %19, %21 : i32
      %c0_i32_17 = arith.constant 0 : i32
      %23 = arith.cmpi ne, %22, %c0_i32_17 : i32
      %c0_i32_18 = arith.constant 0 : i32
      %24 = arith.cmpi slt, %22, %c0_i32_18 : i32
      %c0_i32_19 = arith.constant 0 : i32
      %25 = arith.cmpi slt, %21, %c0_i32_19 : i32
      %26 = arith.xori %24, %25 : i1
      %27 = arith.andi %26, %23 : i1
      %28 = arith.addi %22, %21 : i32
      %29 = arith.select %27, %28, %22 : i32
      %c0_i32_20 = arith.constant 0 : i32
      %c128_i32 = arith.constant 128 : i32
      %30 = arith.addi %c0_i32_20, %c128_i32 : i32
      %c1_i32_21 = arith.constant 1 : i32
      scf.for %arg10 = %c0_i32_20 to %30 step %c1_i32_21  : i32 {
        %c0_i32_38 = arith.constant 0 : i32
        %c0_i32_39 = arith.constant 0 : i32
        %c0_i32_40 = arith.constant 0 : i32
        %c0_i32_41 = arith.constant 0 : i32
        %51 = tpu.memref_slice %arg2[%c0_i32_38, %c0_i32_41] : memref<512x256xf32, #tpu.memory_space<any>> -> memref<1x256xf32, #tpu.memory_space<any>>
        %52 = tpu.memref_squeeze %51 : memref<1x256xf32, #tpu.memory_space<any>> -> memref<256xf32, #tpu.memory_space<any>>
        %c0_i32_42 = arith.constant 0 : i32
        %53 = tpu.memref_slice %arg7[%29, %c0_i32_39, %c0_i32_40, %c0_i32_42] : memref<2x8x16x256xf32, #tpu.memory_space<vmem>> -> memref<1x1x1x256xf32, #tpu.memory_space<vmem>>
        %54 = tpu.memref_squeeze %53 : memref<1x1x1x256xf32, #tpu.memory_space<vmem>> -> memref<256xf32, #tpu.memory_space<vmem>>
        %55 = tpu.memref_slice %arg8[%29] : memref<2x!tpu.dma_semaphore, #tpu.memory_space<semaphore_mem>> -> memref<1x!tpu.dma_semaphore, #tpu.memory_space<semaphore_mem>>
        %56 = tpu.memref_squeeze %55 : memref<1x!tpu.dma_semaphore, #tpu.memory_space<semaphore_mem>> -> memref<!tpu.dma_semaphore, #tpu.memory_space<semaphore_mem>>
        tpu.wait_dma2 semaphore(%56 : memref<!tpu.dma_semaphore, #tpu.memory_space<semaphore_mem>>) src(%52 : memref<256xf32, #tpu.memory_space<any>>) dst(%54 : memref<256xf32, #tpu.memory_space<vmem>>)
      }
      %c1_i32_22 = arith.constant 1 : i32
      %31 = arith.addi %19, %c1_i32_22 : i32
      %c4_i32_23 = arith.constant 4 : i32
      %32 = arith.cmpi slt, %31, %c4_i32_23 : i32
      %33 = arith.extui %32 : i1 to i32
      %c0_i32_24 = arith.constant 0 : i32
      %34 = arith.cmpi ne, %33, %c0_i32_24 : i32
      scf.if %34 {
        %c1_i32_38 = arith.constant 1 : i32
        %51 = arith.addi %19, %c1_i32_38 : i32
        %c1_i32_39 = arith.constant 1 : i32
        %52 = arith.subi %c1_i32_39, %29 : i32
        %c16_i32 = arith.constant 16 : i32
        %53 = arith.muli %51, %c16_i32 : i32
        %c0_i32_40 = arith.constant 0 : i32
        %c8_i32_41 = arith.constant 8 : i32
        %54 = arith.addi %c0_i32_40, %c8_i32_41 : i32
        %c1_i32_42 = arith.constant 1 : i32
        scf.for %arg10 = %c0_i32_40 to %54 step %c1_i32_42  : i32 {
          %c1_i32_44 = arith.constant 1 : i32
          %55 = arith.muli %arg10, %c1_i32_44 : i32
          %c0_i32_45 = arith.constant 0 : i32
          %56 = arith.addi %c0_i32_45, %55 : i32
          %c0_i32_46 = arith.constant 0 : i32
          %c16_i32_47 = arith.constant 16 : i32
          %57 = arith.addi %c0_i32_46, %c16_i32_47 : i32
          %c1_i32_48 = arith.constant 1 : i32
          scf.for %arg11 = %c0_i32_46 to %57 step %c1_i32_48  : i32 {
            %c1_i32_50 = arith.constant 1 : i32
            %58 = arith.muli %arg11, %c1_i32_50 : i32
            %c0_i32_51 = arith.constant 0 : i32
            %59 = arith.addi %c0_i32_51, %58 : i32
            %c8_i32_52 = arith.constant 8 : i32
            %60 = arith.muli %arg0, %c8_i32_52 : i32
            %61 = arith.addi %60, %56 : i32
            %62 = arith.addi %53, %59 : i32
            %63 = arith.index_cast %61 : i32 to index
            %64 = arith.index_cast %62 : i32 to index
            %65 = memref.load %arg1[%63, %64] : memref<16x64xi32, #tpu.memory_space<smem>>
            %c0_i32_53 = arith.constant 0 : i32
            %66 = tpu.memref_slice %arg2[%65, %c0_i32_53] : memref<512x256xf32, #tpu.memory_space<any>> -> memref<1x256xf32, #tpu.memory_space<any>>
            %67 = tpu.memref_squeeze %66 : memref<1x256xf32, #tpu.memory_space<any>> -> memref<256xf32, #tpu.memory_space<any>>
            %c0_i32_54 = arith.constant 0 : i32
            %68 = tpu.memref_slice %arg7[%52, %56, %59, %c0_i32_54] : memref<2x8x16x256xf32, #tpu.memory_space<vmem>> -> memref<1x1x1x256xf32, #tpu.memory_space<vmem>>
            %69 = tpu.memref_squeeze %68 : memref<1x1x1x256xf32, #tpu.memory_space<vmem>> -> memref<256xf32, #tpu.memory_space<vmem>>
            %70 = tpu.memref_slice %arg8[%52] : memref<2x!tpu.dma_semaphore, #tpu.memory_space<semaphore_mem>> -> memref<1x!tpu.dma_semaphore, #tpu.memory_space<semaphore_mem>>
            %71 = tpu.memref_squeeze %70 : memref<1x!tpu.dma_semaphore, #tpu.memory_space<semaphore_mem>> -> memref<!tpu.dma_semaphore, #tpu.memory_space<semaphore_mem>>
            tpu.enqueue_dma source(%67 : memref<256xf32, #tpu.memory_space<any>>) target(%69 : memref<256xf32, #tpu.memory_space<vmem>>) target_semaphore(%71 : memref<!tpu.dma_semaphore, #tpu.memory_space<semaphore_mem>>)
          }
          %c16_i32_49 = arith.constant 16 : i32
        }
        %c8_i32_43 = arith.constant 8 : i32
      } else {
      }
      %35 = arith.index_cast %29 : i32 to index
      %c0_25 = arith.constant 0 : index
      %c0_26 = arith.constant 0 : index
      %c0_27 = arith.constant 0 : index
      %36 = vector.load %arg7[%35, %c0_25, %c0_26, %c0_27] : memref<2x8x16x256xf32, #tpu.memory_space<vmem>>, vector<1x8x16x256xf32>
      %37 = vector.shape_cast %36 : vector<1x8x16x256xf32> to vector<8x16x256xf32>
      %38 = vector.shape_cast %37 : vector<8x16x256xf32> to vector<128x256xf32>
      %39 = arith.truncf %38 : vector<128x256xf32> to vector<128x256xbf16>
      %c0_28 = arith.constant 0 : index
      %c0_29 = arith.constant 0 : index
      %40 = vector.load %arg4[%c0_28, %c0_29] : memref<256x256xbf16, #tpu.memory_space<vmem>>, vector<256x256xbf16>
      %cst_30 = arith.constant dense<0.000000e+00> : vector<128x256xf32>
      %41 = tpu.matmul %39, %40, %cst_30 {dimension_numbers = #tpu.dot_dimension_numbers<[1], [0], [0], [1], [0, 0, 1, 1], [], []>} : vector<128x256xbf16>, vector<256x256xbf16>, vector<128x256xf32> -> vector<128x256xf32>
      %c0_31 = arith.constant 0 : index
      %c0_32 = arith.constant 0 : index
      %42 = vector.load %arg5[%c0_31, %c0_32] : memref<1x256xf32, #tpu.memory_space<vmem>>, vector<1x256xf32>
      %43 = vector.broadcast %42 : vector<1x256xf32> to vector<128x256xf32>
      %44 = arith.addf %41, %43 : vector<128x256xf32>
      %45 = math.tanh %44 : vector<128x256xf32>
      %c0_33 = arith.constant 0 : index
      %c0_34 = arith.constant 0 : index
      %46 = vector.load %arg6[%c0_33, %c0_34] : memref<8x256xf32, #tpu.memory_space<vmem>>, vector<8x256xf32>
      %47 = vector.shape_cast %45 : vector<128x256xf32> to vector<8x16x256xf32>
      %cst_35 = arith.constant dense<0.000000e+00> : vector<8x256xf32>
      %48 = vector.multi_reduction <add>, %47, %cst_35 [1] : vector<8x16x256xf32> to vector<8x256xf32>
      %49 = arith.addf %46, %48 : vector<8x256xf32>
      %c0_36 = arith.constant 0 : index
      %c0_37 = arith.constant 0 : index
      %50 = vector.load %arg6[%c0_36, %c0_37] : memref<8x256xf32, #tpu.memory_space<vmem>>, vector<8x256xf32>
      tpu.vector_store %arg6[%c0_36, %c0_37], %49 {strides = array<i32>} : memref<8x256xf32, #tpu.memory_space<vmem>>, vector<8x256xf32>,
    }
    %c4_i32_4 = arith.constant 4 : i32
    %c0_5 = arith.constant 0 : index
    %c0_6 = arith.constant 0 : index
    %4 = vector.load %arg3[%c0_5, %c0_6] : memref<8x1xf32, #tpu.memory_space<vmem>>, vector<8x1xf32>
    %5 = tpu.reciprocal %4 {approx = true} : vector<8x1xf32> -> vector<8x1xf32>
    %c0_7 = arith.constant 0 : index
    %c0_8 = arith.constant 0 : index
    %6 = vector.load %arg6[%c0_7, %c0_8] : memref<8x256xf32, #tpu.memory_space<vmem>>, vector<8x256xf32>
    %7 = vector.broadcast %5 : vector<8x1xf32> to vector<8x256xf32>
    %8 = arith.mulf %6, %7 : vector<8x256xf32>
    %9 = arith.mulf %8, %8 : vector<8x256xf32>
    %cst_9 = arith.constant dense<0.000000e+00> : vector<8xf32>
    %10 = vector.multi_reduction <add>, %9, %cst_9 [1] : vector<8x256xf32> to vector<8xf32>
    %11 = vector.shape_cast %10 : vector<8xf32> to vector<8x1xf32>
    %12 = math.sqrt %11 : vector<8x1xf32>
    %cst_10 = arith.constant 9.99999996E-13 : f32
    %13 = vector.broadcast %cst_10 : f32 to vector<8x1xf32>
    %14 = arith.maximumf %12, %13 : vector<8x1xf32>
    %15 = vector.broadcast %14 : vector<8x1xf32> to vector<8x256xf32>
    %16 = arith.divf %8, %15 : vector<8x256xf32>
    %c0_11 = arith.constant 0 : index
    %c0_12 = arith.constant 0 : index
    %17 = vector.load %arg6[%c0_11, %c0_12] : memref<8x256xf32, #tpu.memory_space<vmem>>, vector<8x256xf32>
    tpu.vector_store %arg6[%c0_11, %c0_12], %16 {strides = array<i32>} : memref<8x256xf32, #tpu.memory_space<vmem>>, vector<8x256xf32>,
    return
  }
  func.func @transform_1(%arg0: i32, %arg1: memref<16x64xi32, #tpu.memory_space<smem>>) -> (i32, i32) {
    %c0_i32 = arith.constant 0 : i32
    %c0_i32_0 = arith.constant 0 : i32
    return %arg0, %c0_i32 : i32, i32
  }
  func.func @transform_2(%arg0: i32, %arg1: memref<16x64xi32, #tpu.memory_space<smem>>) -> (i32, i32) {
    %c0_i32 = arith.constant 0 : i32
    %c0_i32_0 = arith.constant 0 : i32
    %c0_i32_1 = arith.constant 0 : i32
    return %c0_i32, %c0_i32_0 : i32, i32
  }
  func.func @transform_3(%arg0: i32, %arg1: memref<16x64xi32, #tpu.memory_space<smem>>) -> (i32, i32) {
    %c0_i32 = arith.constant 0 : i32
    %c0_i32_0 = arith.constant 0 : i32
    %c0_i32_1 = arith.constant 0 : i32
    return %c0_i32, %c0_i32_0 : i32, i32
  }
  func.func @transform_4(%arg0: i32, %arg1: memref<16x64xi32, #tpu.memory_space<smem>>) -> (i32, i32) {
    %c0_i32 = arith.constant 0 : i32
    %c0_i32_0 = arith.constant 0 : i32
    return %arg0, %c0_i32 : i32, i32
  }
}

</mosaic_0001>

<bundles_post_ra>
// kernel: tpu_custom_call.1
= control target key start
LH: loop header
LB: loop body
LE: loop exit
PB: predicated region body
PF: predicated region fallthrough
CT: control target
= control target key end

     0   :  { %s1736_s21 = smov [#allocation5]   ;;  %s2107_s0 = inlined_call_operand.vmem [shape: s32[16,64], index: 0, kind: input, shape index: {}]   ;;  %s2108_s1 = inlined_call_operand.hbm [shape: f32[512,256], index: 1, kind: input, shape index: {}]   ;;  %s2109_s2 = inlined_call_operand.vmem [shape: f32[16,1], index: 2, kind: input, shape index: {}]   ;;  %s2110_s3 = inlined_call_operand.hbm [shape: bf16[256,256], index: 3, kind: input, shape index: {}]   ;;  %s2111_s4 = inlined_call_operand.vmem [shape: f32[1,256], index: 4, kind: input, shape index: {}]   ;;  %s2112_s5 = inlined_call_operand.hbm [shape: f32[16,256], index: 5, kind: output, shape index: {}]  }
   0x1   :  { %2130 = sst [smem:[#allocation29_spill]] %s2109_s2  ;;  %s11_s20 = sshll.u32 %s2107_s0, 4  ;;  %s12_s20 = int_to_ptr.vmem [resolvable:$true] %s11_s20 }
   0x2   :  { %2131 = sst [smem:[#allocation30_spill]] %s2110_s3 }
   0x3   :  { %2132 = sst [smem:[#allocation31_spill]] %s2112_s5 }
   0x4   :  { %14 = dma.vmem_to_smem %s12_s20, 256, %s1736_s21, [#allocation4] }
   0x5   :  { %1684 = dma.done.wait [#allocation4], 256 }
   0x6   :  { %1685 = vsyncadd [#allocation4], 4294967040 }
   0x7   :  { %17 = sfence }
   0x8   :  { %18 = vsyncpa [#allocation7], 0 }
   0x9   :  { %19 = vsyncpa [#allocation8], 0 }
   0xa   :  { %21 = vsyncpa [#allocation8 + $0x1], 0  ;;  %s1780_s22 = smov 0   ;;  %s1782_s23 = smov 0  }
   0xb   :  { %s1784_s24 = smov 0   ;;  %s1786_s25 = smov 0  }
   0xc LB: > { %2133 = sst [smem:[#allocation16_spill]] %s1698_s22  ;;  %s1801_s0 = sadd.s32 4294967295, %s1710_s25   ;;  %s1710_s25 = sphi %s1786_s25, %s2167_s25   ;;  %s1706_s24 = sphi %s1784_s24, %s2170_s24   ;;  %s1702_s23 = sphi %s1782_s23, %s2169_s23   ;;  %s1698_s22 = sphi %s1780_s22, %s2168_s22  }
   0xd   : > { %2134 = sst [smem:[#allocation17_spill]] %s1702_s23  ;;  %s1151_s26 = sadd.s32 4294967294, %s1710_s25  }
   0xe   : > { %2135 = sst [smem:[#allocation18_spill]] %s1706_s24  ;;  %s1805_s27 = sadd.s32 1, %s1710_s25  }
   0xf   : > { %2136 = sst [smem:[#allocation19_spill]] %s1710_s25  ;;  %s102_s28 = sadd.s32 1, %s1706_s24 }
  0x10   : > { %2137 = sst [smem:[#allocation20_spill]] %s1801_s0  ;;  %s99_s29 = ssub.s32 %s1710_s25, %s1805_s27 }
  0x11   : > { %2138 = sst [smem:[#allocation21_spill]] %s1805_s27  ;;  %p112_p0 = scmp.ne.s32.totalorder %s1706_s24, %s1702_s23 }
  0x12   : > { %p100_p1 = scmp.eq.s32.totalorder %s99_s29, 0  ;;  %p113_p2 = scmp.eq.s32.totalorder %s1801_s0, 1 }
  0x13   : > { %p118_p3 = scmp.ne.s32.totalorder %s1702_s23, %s1698_s22  ;;  %p119_p4 = scmp.eq.s32.totalorder %s1151_s26, 1 }
  0x14   : > { %s1816_s30 = scalar_select %p100_p1, %s1706_s24, %s102_s28  }
  0x15   : > { %p1818_p5 = por %p113_p2, %p112_p0  ;;  %p1822_p6 = por %p119_p4, %p118_p3 }
  0x16   : > { %2139 = sst [smem:[#allocation22_spill]] %s1816_s30  ;;  %p1152_p7 = scmp.ge.s32.totalorder %s1710_s25, 1 }
  0x17   : > { %s2140_s6 = scalar_select %p1818_p5, 1, 0 }
  0x18   : > { %s2142_s7 = scalar_select %p1822_p6, 1, 0 }
  0x19   : > { %2141 = sst [smem:[#allocation23_spill]] %s2140_s6  ;;  %p126_p8 = scmp.lt.s32.totalorder %s1710_s25, 3 }
  0x1a   : > { %2143 = sst [smem:[#allocation24_spill]] %s2142_s7  ;;  %p1362_p9 = scmp.eq.s32.totalorder %s1801_s0, 0 }
  0x1b   : > { %p127_p10 = pnand %p1152_p7, %p126_p8  ;;  %s2144_s3 = sld [smem:[#allocation30_spill]] }
  0x1c   : > { %s1737_s11 = smov [#allocation6]   ;;  %s1738_s13 = smov 128  }
  0x1d   : > { %p1354_p11 = pneg %p127_p10  ;;  %s139_s12 = sshll.u32 %s1737_s11, 4  ;;  %s140_s12 = int_to_ptr.vmem [resolvable:$true] %s139_s12 }
  0x1e   : > { %s1739_s14 = smov 8   ;;  %165 = sbr.rel (%p127_p10) target bundleno = 761 (0x2f9), region = 32 }
  0x1f   : > { %p1355_p12 = pnand %p1362_p9, %p1354_p11 }
  0x21   : > { %s137_s10 = sshll.u32 %s2144_s3, 4  ;;  %s138_s10 = int_to_ptr.hbm [resolvable:$true] %s137_s10 }
  0x22   : > { %1357 = dma.hbm_to_vmem [thread:$0]  (!%p1355_p12), %s138_s10, 4096, %s140_s12, [#allocation7], %s1738_s13, %s1738_s13, %s1739_s14  }
  0x23   : > { %1687 = dma.done.wait (%p1362_p9), [#allocation7], 4096  }
  0x24   : > { %1689 = vsyncadd (%p1362_p9), [#allocation7], 4294963200  ;;  %s2113_s15 = sand.u32 1, %s1702_s23   ;;  %p189_p13 = scmp.lt.s32.totalorder %s1801_s0, 1  ;;  %v1740_v0 = vmov 0.0  }
  0x25   : > { %s1157_s16 = sshll.u32 %s2113_s15, 4  ;;  %s2145_s2 = sld [smem:[#allocation29_spill]] }
  0x26   : > { %s190_s17 = scalar_select %p189_p13, %s1801_s0, 1 }
  0x27   : > { %s1843_s18 = scalar_lea.vmem [#allocation9], %s1157_s16  ;;  %s1852_s28 = smov 0  }
  0x28   : > { %193 = vst [vmem:[%s1843_s18] sm:$0xff] %v1740_v0  ;;  %s1158_s19 = sshll.u32 %s190_s17, 3 }
  0x29   : > { %194 = vst [vmem:[%s1843_s18 + $0x8] sm:$0xff] %v1740_v0 }
  0x2b   : > { %s1850_s26 = scalar_lea.vmem %s2145_s2, %s1158_s19 }
  0x2c   : > { %2146 = sst [smem:[#allocation25_spill]] %s1850_s26 }
  0x2d LB: >> { %s1857_s29 = smov 0   ;;  %s1714_s28 = sphi %s1852_s28, %s200_s28  }
  0x2e LB: >>> { %s2118_s8 = sshll.u32 %s1801_s0, 3  ;;  %s209_s10 = sshra.s32 %s1718_s29, 7  ;;  %s1718_s29 = sphi %s1857_s29, %s206_s29  }
  0x2f   : >>> { %s208_s9 = sadd.s32 %s1714_s28, %s2118_s8  ;;  %s214_s11 = sand.u32 127, %s1718_s29 }
  0x30   : >>> { %s211_s12 = sadd.s32 %s209_s10, %s208_s9  ;;  %s222_s13 = sshrl.u32 %s1718_s29, 3 }
  0x31   : >>> { %s1160_s14 = sshll.u32 %s211_s12, 7  ;;  %s223_s16 = sand.u32 7, %s1718_s29  }
  0x32   : >>> { %s215_s17 = sadd.s32 %s1160_s14, %s214_s11  ;;  %s1162_s19 = sshll.u32 %s222_s13, 4 }
  0x33   : >>> { %s216_s20 = sld [smem:[#allocation5 + %s215_s17]]  ;;  %s225_s21 = sadd.s32 %s1162_s19, %s223_s16 }
  0x34   : >>> { %s1163_s15 = sshll.u32 %s1714_s28, 5  ;;  %s2122_s12 = scalar_lea.hbm %s2108_s1, 1024 }
  0x35   : >>> { %s227_s2 = sadd.s32 %s1163_s15, %s225_s21 }
  0x36   : >>> { %s228_s3 = scalar_lea.vmem [#allocation2], %s227_s2 }
  0x37   : >>> { %s1871_s30 = sshll.u32 %s228_s3, 4  ;;  %s232_s30 = int_to_ptr.vmem [resolvable:$true] %s1871_s30 }
  0x39   : >>> { %s217_s24 = sshrl.u32 %s216_s20, 3  ;;  %s218_s27 = sand.u32 7, %s216_s20  }
  0x3a   : >>> { %s1161_s7 = sshll.u32 %s217_s24, 4 }
  0x3b   : >>> { %s220_s8 = sadd.s32 %s1161_s7, %s218_s27 }
  0x3c   : >>> { %s221_s9 = scalar_lea.hbm %s2108_s1, %s220_s8 }
  0x3d   : >>> { %s1877_s10 = sshll.u32 %s221_s9, 4  ;;  %s230_s10 = int_to_ptr.hbm [resolvable:$true] %s1877_s10 }
  0x3e   : >>> { %s1568_s11 = sshra.s32 %s230_s10, 4  ;;  %s1569_s11 = int_to_ptr.hbm [resolvable:$true] %s1568_s11 }
  0x3f   : >>> { %s1570_s15 = scalar_lea.hbm %s1569_s11, 2  ;;  %p1573_p1 = scmp.lt.s32.totalorder %s1569_s11, %s2108_s1 }
  0x40   : >>> { %p1571_p0 = scmp.ne.s32.totalorder %s1569_s11, %s1570_s15  ;;  %p1574_p2 = scmp.lt.s32.totalorder %s2122_s12, %s1570_s15 }
  0x42   : >>> { %p1575_p3 = por %p1574_p2, %p1573_p1 }
  0x44   : >>> { %p1576_p4 = pnand %p1575_p3, %p1571_p0 }
  0x46   : >>> { %1579 = shalt.err (!%p1576_p4)  }
  0x47   : >>> { %s1580_s25 = sshra.s32 %s232_s30, 4  ;;  %s1741_s8 = smov [#allocation2]   ;;  %s1581_s25 = int_to_ptr.vmem [resolvable:$true] %s1580_s25 }
  0x48   : >>> { %s1582_s7 = scalar_lea.vmem %s1581_s25, 2  ;;  %s1892_s14 = scalar_lea.vmem %s1741_s8, 512 }
  0x49   : >>> { %p1583_p7 = scmp.ne.s32.totalorder %s1581_s25, %s1582_s7  ;;  %p1585_p8 = scmp.lt.s32.totalorder %s1581_s25, [#allocation2] }
  0x4a   : >>> { %p1586_p9 = scmp.lt.s32.totalorder %s1892_s14, %s1582_s7 }
  0x4c   : >>> { %p1587_p10 = por %p1586_p9, %p1585_p8 }
  0x4e   : >>> { %p1588_p11 = pnand %p1587_p10, %p1583_p7 }
  0x50   : >>> { %1591 = shalt.err (!%p1588_p11)  }
  0x51   : >>> { %s1742_s16 = smov 128   ;;  %s1743_s17 = smov 1  }
  0x52   : >>> { %236 = dma.hbm_to_vmem [thread:$0]  %s230_s10, 32, %s232_s30, [#allocation3], %s1742_s16, %s1742_s16, %s1743_s17 }
  0x53   : >>> { %s206_s29 = sadd.s32 1, %s1718_s29  }
  0x54   : >>> { %p203_p12 = scmp.ge.s32.totalorder %s206_s29, 16  }
  0x55   : >> { %s200_s28 = sadd.s32 (%p203_p12), 1, %s1714_s28  }
  0x56   : >> { %205 = sbr.rel (!%p203_p12) target bundleno = 46 (0x2e), region = 126  ;;  %p197_p13 = scmp.ge.s32.totalorder (%p203_p12), %s200_s28, 8  }
  0x5b   : > { %199 = sbr.rel (!%p197_p13) target bundleno = 45 (0x2d), region = 137  ;;  %s1903_s19 = smov (%p197_p13), 0  }
  0x60 LB: >> { %2147 = sst [smem:[#allocation26_spill]] %s1722_s19  ;;  %p243_p0 = scmp.lt.s32.totalorder %s1722_s19, 0  ;;  %s1722_s19 = sphi %s1903_s19, %s2156_s19  }
  0x61   : >> { %s244_s30 = ssub.s32 0, %s1722_s19  ;;  %s1724_s28 = smov 0  }
  0x62   : >> { %s1164_s29 = smin.u32 %s1722_s19, %s244_s30 }
  0x63   : >> { %s246_s20 = sand.u32 1, %s1164_s29  }
  0x64   : >> { %s247_s21 = ssub.s32 0, %s246_s20 }
  0x65   : >> { %s2172_s21 = smov (!%p243_p0, %s247_s21), %s246_s20 }
  0x66   : >> { %p1166_p1 = scmp.lt.s32.totalorder %s2172_s21, 0  ;;  %s253_s9 = sadd.s32 2, %s2172_s21 }
  0x68   : >> { %s2174_s9 = smov (!%p1166_p1, %s253_s9), %s2172_s21 }
  0x69 LB: >>> { %s261_s10 = scalar_lea.sflag [#allocation3], %s2174_s9  ;;  %s1726_s28 = sphi %s1724_s28, %s260_s28  }
  0x6a   : >>> { %1690 = dma.done.wait %s261_s10, 32 }
  0x6b   : >>> { %1691 = vsyncadd %s261_s10, 4294967264  ;;  %s260_s28 = sadd.s32 1, %s1726_s28  }
  0x6c   : >>> { %p257_p2 = scmp.ge.s32.totalorder %s260_s28, 128  }
  0x6d   : >> { %s2121_s11 = sadd.s32 (%p257_p2), 1, %s1722_s19  }
  0x6e   : >> { %259 = sbr.rel (!%p257_p2) target bundleno = 105 (0x69), region = 148  ;;  %p1917_p3 = scmp.ge.s32.totalorder (%p257_p2), %s2121_s11, 4 }
  0x73   : >> { %s2148_s15 = scalar_select %p1917_p3, 1, 0 }
  0x74   : >> { %268 = sbr.rel (%p1917_p3) target bundleno = 178 (0xb2), region = 68  ;;  %s269_s2 = ssub.s32 (!%p1917_p3), 1, %s2174_s9 }
  0x75   : >> { %2149 = sst [smem:[#allocation27_spill]] %s2148_s15  ;;  %s1312_s3 = sshll.u32 (!%p1917_p3), %s1722_s19, 4 }
  0x76   : >> { %s1925_s13 = sadd.s32 (!%p1917_p3), 16, %s1312_s3  ;;  %s1927_s24 = smov (!%p1917_p3), 0  }
  0x77   : >> { %2150 = sst [smem:[#allocation28_spill]] (!%p1917_p3), %s1925_s13 }
  0x79 LB: >>> { %s1932_s27 = smov 0   ;;  %s1730_s24 = sphi %s1927_s24, %s276_s24  }
  0x7a LB: >>>> { %s2151_s0 = sld [smem:[#allocation20_spill]]  ;;  %s1173_s7 = sshll.u32 %s1730_s24, 5  ;;  %s1734_s27 = sphi %s1932_s27, %s282_s27  }
  0x7b   : >>>> { %s2152_s13 = sld [smem:[#allocation28_spill]]  ;;  %s299_s16 = sshrl.u32 %s1734_s27, 3 }
  0x7c   : >>>> { %s300_s20 = sand.u32 7, %s1734_s27   ;;  %s1172_s28 = sshll.u32 %s299_s16, 4 }
  0x7d   : >>>> { %s302_s3 = sadd.s32 %s1172_s28, %s300_s20  ;;  %s1174_s6 = sshll.u32 %s269_s2, 8 }
  0x7e   : >>>> { %s304_s12 = sadd.s32 %s1173_s7, %s302_s3 }
  0x7f   : >>>> { %s306_s23 = sadd.s32 %s1174_s6, %s304_s12 }
  0x80   : >>>> { %s2153_s22 = sshll.u32 %s2151_s0, 3  ;;  %s307_s5 = scalar_lea.vmem [#allocation2], %s306_s23 }
  0x81   : >>>> { %s284_s25 = sadd.s32 %s1730_s24, %s2153_s22  ;;  %s285_s8 = sadd.s32 %s1734_s27, %s2152_s13 }
  0x82   : >>>> { %s286_s17 = sshra.s32 %s285_s8, 7  ;;  %s291_s30 = sand.u32 127, %s285_s8 }
  0x83   : >>>> { %s288_s29 = sadd.s32 %s286_s17, %s284_s25  ;;  %s311_s0 = sshll.u32 %s307_s5, 4  ;;  %s312_s0 = int_to_ptr.vmem [resolvable:$true] %s311_s0 }
  0x84   : >>>> { %s1170_s21 = sshll.u32 %s288_s29, 7  ;;  %s308_s17 = scalar_lea.sflag [#allocation3], %s269_s2 }
  0x85   : >>>> { %s292_s10 = sadd.s32 %s1170_s21, %s291_s30 }
  0x86   : >>>> { %s293_s11 = sld [smem:[#allocation5 + %s292_s10]] }
  0x8c   : >>>> { %s294_s22 = sshrl.u32 %s293_s11, 3  ;;  %s295_s26 = sand.u32 7, %s293_s11  }
  0x8d   : >>>> { %s1171_s13 = sshll.u32 %s294_s22, 4 }
  0x8e   : >>>> { %s297_s15 = sadd.s32 %s1171_s13, %s295_s26  ;;  %s2154_s26 = scalar_lea.hbm %s2108_s1, 1024 }
  0x8f   : >>>> { %s298_s25 = scalar_lea.hbm %s2108_s1, %s297_s15 }
  0x90   : >>>> { %s309_s16 = sshll.u32 %s298_s25, 4  ;;  %s310_s16 = int_to_ptr.hbm [resolvable:$true] %s309_s16 }
  0x91   : >>>> { %s1592_s30 = sshra.s32 %s310_s16, 4  ;;  %s1593_s30 = int_to_ptr.hbm [resolvable:$true] %s1592_s30 }
  0x92   : >>>> { %s1594_s7 = scalar_lea.hbm %s1593_s30, 2  ;;  %p1597_p7 = scmp.lt.s32.totalorder %s1593_s30, %s2108_s1 }
  0x93   : >>>> { %p1595_p4 = scmp.ne.s32.totalorder %s1593_s30, %s1594_s7  ;;  %p1598_p8 = scmp.lt.s32.totalorder %s2154_s26, %s1594_s7 }
  0x95   : >>>> { %p1599_p9 = por %p1598_p8, %p1597_p7 }
  0x97   : >>>> { %p1600_p10 = pnand %p1599_p9, %p1595_p4 }
  0x99   : >>>> { %1603 = shalt.err (!%p1600_p10)  }
  0x9a   : >>>> { %s1604_s19 = sshra.s32 %s312_s0, 4  ;;  %s1605_s19 = int_to_ptr.vmem [resolvable:$true] %s1604_s19 }
  0x9b   : >>>> { %s1606_s11 = scalar_lea.vmem %s1605_s19, 2  ;;  %p1609_p12 = scmp.lt.s32.totalorder %s1605_s19, [#allocation2] }
  0x9c   : >>>> { %p1607_p11 = scmp.ne.s32.totalorder %s1605_s19, %s1606_s11  ;;  %p1610_p13 = scmp.lt.s32.totalorder %s1892_s14, %s1606_s11 }
  0x9e   : >>>> { %p1611_p0 = por %p1610_p13, %p1609_p12 }
  0xa0   : >>>> { %p1612_p1 = pnand %p1611_p0, %p1607_p11 }
  0xa2   : >>>> { %1615 = shalt.err (!%p1612_p1)  }
  0xa3   : >>>> { %s1744_s15 = smov 128   ;;  %s1745_s13 = smov 1  }
  0xa4   : >>>> { %316 = dma.hbm_to_vmem [thread:$0]  %s310_s16, 32, %s312_s0, %s308_s17, %s1744_s15, %s1744_s15, %s1745_s13 }
  0xa5   : >>>> { %s282_s27 = sadd.s32 1, %s1734_s27  }
  0xa6   : >>>> { %p279_p2 = scmp.ge.s32.totalorder %s282_s27, 16  }
  0xa7   : >>> { %s276_s24 = sadd.s32 (%p279_p2), 1, %s1730_s24  }
  0xa8   : >>> { %281 = sbr.rel (!%p279_p2) target bundleno = 122 (0x7a), region = 159  ;;  %p273_p4 = scmp.ge.s32.totalorder (%p279_p2), %s276_s24, 8  }
  0xad   : >> { %275 = sbr.rel (!%p273_p4) target bundleno = 121 (0x79), region = 170 }
  0xb2 PF: >> { %v1235_v1 = vld [vmem:[#allocation6 + $0x70] sm:$0xf]  ;;  %v1330_v2 = vld [vmem:[#allocation6 + $0x74] sm:$0xf0]  ;;  %v1329_v6 = vld [vmem:[#allocation6 + $0x74] sm:$0xf] }
  0xb3   : >> { %v1299_v3 = vld [vmem:[#allocation6 + $0xf0] sm:$0xf]  ;;  %v1236_v4 = vor.u32 %v1330_v2, %v1235_v1  ;;  %v1346_v5 = vld [vmem:[#allocation6 + $0xf4] sm:$0xf0]  ;;  %v1237_v7 = vld [vmem:[#allocation6 + $0x78] sm:$0xf0] }
  0xb4   : >> { %v1300_v8 = vor.u32 %v1346_v5, %v1299_v3  ;;  %v1240_v9 = vor.u32 %v1329_v6, %v1237_v7  ;;  %v1345_v10 = vld [vmem:[#allocation6 + $0xf4] sm:$0xf]  ;;  %v1301_v11 = vld [vmem:[#allocation6 + $0xf8] sm:$0xf0]  ;;  %v1227_v12 = vld [vmem:[#allocation6 + $0x60] sm:$0xf] }
  0xb5   : >> { %566 = vmatpush.bf16.msra.mxu0 %v1236_v4  ;;  %v1304_v13 = vor.u32 %v1345_v10, %v1301_v11  ;;  %v1328_v14 = vld [vmem:[#allocation6 + $0x64] sm:$0xf0]  ;;  %v1291_v15 = vld [vmem:[#allocation6 + $0xe0] sm:$0xf]  ;;  %v1327_v19 = vld [vmem:[#allocation6 + $0x64] sm:$0xf] }
  0xb6   : >> { %v1344_v16 = vld [vmem:[#allocation6 + $0xe4] sm:$0xf0]  ;;  %615 = vmatpush.bf16.msra.mxu1 %v1300_v8  ;;  %664 = vmatpush.bf16.msra.mxu2 %v1240_v9  ;;  %v1228_v17 = vor.u32 %v1328_v14, %v1227_v12  ;;  %v1229_v20 = vld [vmem:[#allocation6 + $0x68] sm:$0xf0]  ;;  %v1343_v21 = vld [vmem:[#allocation6 + $0xe4] sm:$0xf] }
  0xb7   : >> { %v1292_v18 = vor.u32 %v1344_v16, %v1291_v15  ;;  %713 = vmatpush.bf16.msra.mxu3 %v1304_v13  ;;  %v1232_v22 = vor.u32 %v1327_v19, %v1229_v20  ;;  %v1293_v23 = vld [vmem:[#allocation6 + $0xe8] sm:$0xf0]  ;;  %v1219_v24 = vld [vmem:[#allocation6 + $0x50] sm:$0xf]  ;;  %v1326_v25 = vld [vmem:[#allocation6 + $0x54] sm:$0xf0] }
  0xb8   : >> { %v1296_v26 = vor.u32 %v1343_v21, %v1293_v23  ;;  %v1283_v27 = vld [vmem:[#allocation6 + $0xd0] sm:$0xf]  ;;  %v1342_v28 = vld [vmem:[#allocation6 + $0xd4] sm:$0xf0]  ;;  %v1325_v29 = vld [vmem:[#allocation6 + $0x54] sm:$0xf]  ;;  %v1220_v30 = vor.u32 %v1326_v25, %v1219_v24 }
  0xb9   : >> { %567 = vmatpush.bf16.msra.mxu0 %v1228_v17  ;;  %v1221_v31 = vld [vmem:[#allocation6 + $0x58] sm:$0xf0]  ;;  %v1341_v32 = vld [vmem:[#allocation6 + $0xd4] sm:$0xf]  ;;  %v1284_v34 = vor.u32 %v1342_v28, %v1283_v27  ;;  %v1211_v36 = vld [vmem:[#allocation6 + $0x40] sm:$0xf] }
  0xba   : >> { %v1285_v33 = vld [vmem:[#allocation6 + $0xd8] sm:$0xf0]  ;;  %616 = vmatpush.bf16.msra.mxu1 %v1292_v18  ;;  %665 = vmatpush.bf16.msra.mxu2 %v1232_v22  ;;  %v1224_v35 = vor.u32 %v1325_v29, %v1221_v31  ;;  %v1324_v37 = vld [vmem:[#allocation6 + $0x44] sm:$0xf0]  ;;  %v1275_v38 = vld [vmem:[#allocation6 + $0xc0] sm:$0xf] }
  0xbb   : >> { %714 = vmatpush.bf16.msra.mxu3 %v1296_v26  ;;  %v1288_v39 = vor.u32 %v1341_v32, %v1285_v33  ;;  %v1340_v40 = vld [vmem:[#allocation6 + $0xc4] sm:$0xf0]  ;;  %v1323_v41 = vld [vmem:[#allocation6 + $0x44] sm:$0xf]  ;;  %v1213_v42 = vld [vmem:[#allocation6 + $0x48] sm:$0xf0]  ;;  %v1212_v45 = vor.u32 %v1324_v37, %v1211_v36 }
  0xbc   : >> { %v1339_v43 = vld [vmem:[#allocation6 + $0xc4] sm:$0xf]  ;;  %v1277_v44 = vld [vmem:[#allocation6 + $0xc8] sm:$0xf0]  ;;  %v1276_v46 = vor.u32 %v1340_v40, %v1275_v38  ;;  %v1216_v47 = vor.u32 %v1323_v41, %v1213_v42  ;;  %v1203_v48 = vld [vmem:[#allocation6 + $0x30] sm:$0xf] }
  0xbd   : >> { %568 = vmatpush.bf16.msra.mxu0 %v1220_v30  ;;  %v1322_v49 = vld [vmem:[#allocation6 + $0x34] sm:$0xf0]  ;;  %v1267_v50 = vld [vmem:[#allocation6 + $0xb0] sm:$0xf]  ;;  %v1280_v51 = vor.u32 %v1339_v43, %v1277_v44  ;;  %v1321_v53 = vld [vmem:[#allocation6 + $0x34] sm:$0xf] }
  0xbe   : >> { %617 = vmatpush.bf16.msra.mxu1 %v1284_v34  ;;  %666 = vmatpush.bf16.msra.mxu2 %v1224_v35  ;;  %v1338_v52 = vld [vmem:[#allocation6 + $0xb4] sm:$0xf0]  ;;  %v1205_v54 = vld [vmem:[#allocation6 + $0x38] sm:$0xf0]  ;;  %v1337_v55 = vld [vmem:[#allocation6 + $0xb4] sm:$0xf]  ;;  %v1204_v57 = vor.u32 %v1322_v49, %v1203_v48 }
  0xbf   : >> { %715 = vmatpush.bf16.msra.mxu3 %v1288_v39  ;;  %v1269_v56 = vld [vmem:[#allocation6 + $0xb8] sm:$0xf0]  ;;  %v1268_v58 = vor.u32 %v1338_v52, %v1267_v50  ;;  %v1208_v59 = vor.u32 %v1321_v53, %v1205_v54  ;;  %v1195_v60 = vld [vmem:[#allocation6 + $0x20] sm:$0xf]  ;;  %v1320_v61 = vld [vmem:[#allocation6 + $0x24] sm:$0xf0] }
  0xc0   : >> { %v1259_v62 = vld [vmem:[#allocation6 + $0xa0] sm:$0xf]  ;;  %v1272_v63 = vor.u32 %v1337_v55, %v1269_v56  ;;  %v1336_v0 = vld [vmem:[#allocation6 + $0xa4] sm:$0xf0]  ;;  %v1319_v1 = vld [vmem:[#allocation6 + $0x24] sm:$0xf]  ;;  %v1196_v5 = vor.u32 %v1320_v61, %v1195_v60 }
  0xc1   : >> { %569 = vmatpush.bf16.msra.mxu0 %v1212_v45  ;;  %v1197_v2 = vld [vmem:[#allocation6 + $0x28] sm:$0xf0]  ;;  %v1335_v3 = vld [vmem:[#allocation6 + $0xa4] sm:$0xf]  ;;  %v1187_v6 = vld [vmem:[#allocation6 + $0x10] sm:$0xf]  ;;  %v1260_v7 = vor.u32 %v1336_v0, %v1259_v62 }
  0xc2   : >> { %618 = vmatpush.bf16.msra.mxu1 %v1276_v46  ;;  %667 = vmatpush.bf16.msra.mxu2 %v1216_v47  ;;  %v1261_v4 = vld [vmem:[#allocation6 + $0xa8] sm:$0xf0]  ;;  %v1200_v8 = vor.u32 %v1319_v1, %v1197_v2  ;;  %v1318_v9 = vld [vmem:[#allocation6 + $0x14] sm:$0xf0]  ;;  %v1251_v10 = vld [vmem:[#allocation6 + $0x90] sm:$0xf] }
  0xc3   : >> { %716 = vmatpush.bf16.msra.mxu3 %v1280_v51  ;;  %v1334_v11 = vld [vmem:[#allocation6 + $0x94] sm:$0xf0]  ;;  %v1264_v12 = vor.u32 %v1335_v3, %v1261_v4  ;;  %v1317_v13 = vld [vmem:[#allocation6 + $0x14] sm:$0xf]  ;;  %v1189_v14 = vld [vmem:[#allocation6 + $0x18] sm:$0xf0]  ;;  %v1188_v17 = vor.u32 %v1318_v9, %v1187_v6 }
  0xc4   : >> { %s1314_s0 = sshll.u32 %s2174_s9, 8  ;;  %v1333_v15 = vld [vmem:[#allocation6 + $0x94] sm:$0xf]  ;;  %v1253_v16 = vld [vmem:[#allocation6 + $0x98] sm:$0xf0]  ;;  %v1252_v19 = vor.u32 %v1334_v11, %v1251_v10  ;;  %v1192_v20 = vor.u32 %v1317_v13, %v1189_v14  ;;  %vm924_vm0 = vcmask 1041409  }
  0xc5   : >> { %570 = vmatpush.bf16.msra.mxu0 %v1204_v57  ;;  %v1179_v18 = vld [vmem:[#allocation6] sm:$0xf]  ;;  %v1316_v21 = vld [vmem:[#allocation6 + $0x4] sm:$0xf0]  ;;  %v1256_v23 = vor.u32 %v1333_v15, %v1253_v16  ;;  %v1315_v25 = vld [vmem:[#allocation6 + $0x4] sm:$0xf] }
  0xc6   : >> { %619 = vmatpush.bf16.msra.mxu1 %v1268_v58  ;;  %668 = vmatpush.bf16.msra.mxu2 %v1208_v59  ;;  %v1243_v22 = vld [vmem:[#allocation6 + $0x80] sm:$0xf]  ;;  %v1332_v24 = vld [vmem:[#allocation6 + $0x84] sm:$0xf0]  ;;  %v1181_v26 = vld [vmem:[#allocation6 + $0x8] sm:$0xf0]  ;;  %v1180_v29 = vor.u32 %v1316_v21, %v1179_v18 }
  0xc7   : >> { %717 = vmatpush.bf16.msra.mxu3 %v1272_v63  ;;  %v1331_v27 = vld [vmem:[#allocation6 + $0x84] sm:$0xf]  ;;  %v1245_v28 = vld [vmem:[#allocation6 + $0x88] sm:$0xf0]  ;;  %s1967_s9 = scalar_lea.vmem [#allocation2], %s1314_s0  ;;  %v1244_v32 = vor.u32 %v1332_v24, %v1243_v22  ;;  %v1184_v33 = vor.u32 %v1315_v25, %v1181_v26  ;;  %vm926_vm1 = vcmask 1042434  }
  0xc8   : >> { %v320_v30 = vld [vmem:[%s1967_s9] sm:$0xff]  ;;  %v322_v31 = vld [vmem:[%s1967_s9 + $0x10] sm:$0xff]  ;;  %v321_v34 = vld [vmem:[%s1967_s9 + $0x8] sm:$0xff]  ;;  %v1248_v36 = vor.u32 %v1331_v27, %v1245_v28  ;;  %vm928_vm2 = vcmask 1043459   ;;  %vm930_vm3 = vcmask 1044484   ;;  %vm932_vm4 = vcmask 1045509  }
  0xc9   : >> { %571 = vmatpush.bf16.msra.mxu0 %v1196_v5  ;;  %v323_v35 = vld [vmem:[%s1967_s9 + $0x18] sm:$0xff]  ;;  %v352_v37 = vpack.c.bf16 %v322_v31, %v320_v30  ;;  %v324_v39 = vld [vmem:[%s1967_s9 + $0x20] sm:$0xff]  ;;  %v326_v40 = vld [vmem:[%s1967_s9 + $0x30] sm:$0xff]  ;;  %vm934_vm5 = vcmask 1046534   ;;  %vm936_vm6 = vcmask 1047559   ;;  %s2155_s19 = sld [smem:[#allocation26_spill]] }
  0xca   : >> { %620 = vmatpush.bf16.msra.mxu1 %v1260_v7  ;;  %669 = vmatpush.bf16.msra.mxu2 %v1200_v8  ;;  %v353_v38 = vpack.c.bf16 %v323_v35, %v321_v34  ;;  %v325_v41 = vld [vmem:[%s1967_s9 + $0x28] sm:$0xff]  ;;  %v327_v42 = vld [vmem:[%s1967_s9 + $0x38] sm:$0xff]  ;;  %v354_v43 = vpack.c.bf16 %v326_v40, %v324_v39  ;;  %v328_v45 = vld [vmem:[%s1967_s9 + $0x40] sm:$0xff]  ;;  %s2158_s29 = sld [smem:[#allocation25_spill]] (%p1917_p3)  ;;  %s1012_s25 = sshll.u32 (%p1917_p3), %s1843_s18, 4  ;;  %s1013_s25 = int_to_ptr.vmem [resolvable:$true] %s1012_s25 }
  0xcb   : >> { %718 = vmatpush.bf16.msra.mxu3 %v1264_v12  ;;  %v355_v44 = vpack.c.bf16 %v327_v42, %v325_v41  ;;  %v330_v46 = vld [vmem:[%s1967_s9 + $0x50] sm:$0xff]  ;;  %v329_v47 = vld [vmem:[%s1967_s9 + $0x48] sm:$0xff]  ;;  %v331_v48 = vld [vmem:[%s1967_s9 + $0x58] sm:$0xff]  ;;  %s2159_s14 = sld [smem:[#allocation20_spill]] (%p1917_p3) }
  0xcc   : >> { %v356_v49 = vpack.c.bf16 %v330_v46, %v328_v45  ;;  %v357_v50 = vpack.c.bf16 %v331_v48, %v329_v47  ;;  %v332_v51 = vld [vmem:[%s1967_s9 + $0x60] sm:$0xff]  ;;  %v334_v52 = vld [vmem:[%s1967_s9 + $0x70] sm:$0xff]  ;;  %v333_v53 = vld [vmem:[%s1967_s9 + $0x68] sm:$0xff]  ;;  %s2160_s10 = sld [smem:[#allocation31_spill]] (%p1917_p3) }
  0xcd   : >> { %572 = vmatpush.bf16.msra.mxu0 %v1188_v17  ;;  %v335_v54 = vld [vmem:[%s1967_s9 + $0x78] sm:$0xff]  ;;  %v358_v55 = vpack.c.bf16 %v334_v52, %v332_v51  ;;  %v336_v57 = vld [vmem:[%s1967_s9 + $0x80] sm:$0xff]  ;;  %v338_v58 = vld [vmem:[%s1967_s9 + $0x90] sm:$0xff]  ;;  %s2161_s22 = sld [smem:[#allocation17_spill]] (%p1917_p3) }
  0xce   : >> { %621 = vmatpush.bf16.msra.mxu1 %v1252_v19  ;;  %670 = vmatpush.bf16.msra.mxu2 %v1192_v20  ;;  %v359_v56 = vpack.c.bf16 %v335_v54, %v333_v53  ;;  %v337_v59 = vld [vmem:[%s1967_s9 + $0x88] sm:$0xff]  ;;  %v339_v60 = vld [vmem:[%s1967_s9 + $0x98] sm:$0xff]  ;;  %v360_v61 = vpack.c.bf16 %v338_v58, %v336_v57  ;;  %v340_v63 = vld [vmem:[%s1967_s9 + $0xa0] sm:$0xff] }
  0xcf   : >> { %719 = vmatpush.bf16.msra.mxu3 %v1256_v23  ;;  %v361_v62 = vpack.c.bf16 %v339_v60, %v337_v59  ;;  %v342_v0 = vld [vmem:[%s1967_s9 + $0xb0] sm:$0xff]  ;;  %v341_v1 = vld [vmem:[%s1967_s9 + $0xa8] sm:$0xff]  ;;  %v343_v2 = vld [vmem:[%s1967_s9 + $0xb8] sm:$0xff]  ;;  %s2156_s19 = sadd.s32 1, %s2155_s19  }
  0xd0   : >> { %v362_v3 = vpack.c.bf16 %v342_v0, %v340_v63  ;;  %v363_v4 = vpack.c.bf16 %v343_v2, %v341_v1  ;;  %v344_v5 = vld [vmem:[%s1967_s9 + $0xc0] sm:$0xff]  ;;  %v346_v6 = vld [vmem:[%s1967_s9 + $0xd0] sm:$0xff]  ;;  %v345_v7 = vld [vmem:[%s1967_s9 + $0xc8] sm:$0xff] }
  0xd1   : >> { %573 = vmatpush.bf16.msra.mxu0 %v1180_v29  ;;  %v347_v8 = vld [vmem:[%s1967_s9 + $0xd8] sm:$0xff]  ;;  %v364_v9 = vpack.c.bf16 %v346_v6, %v344_v5  ;;  %v348_v11 = vld [vmem:[%s1967_s9 + $0xe0] sm:$0xff]  ;;  %v350_v12 = vld [vmem:[%s1967_s9 + $0xf0] sm:$0xff]  ;;  %s1347_s20 = sshll.u32 (%p1917_p3), %s2159_s14, 4 }
  0xd2   : >> { %622 = vmatpush.bf16.msra.mxu1 %v1244_v32  ;;  %671 = vmatpush.bf16.msra.mxu2 %v1184_v33  ;;  %v365_v10 = vpack.c.bf16 %v347_v8, %v345_v7  ;;  %v349_v13 = vld [vmem:[%s1967_s9 + $0xe8] sm:$0xff]  ;;  %v351_v14 = vld [vmem:[%s1967_s9 + $0xf8] sm:$0xff]  ;;  %v366_v15 = vpack.c.bf16 %v350_v12, %v348_v11  ;;  %v400_v17 = vld [vmem:[%s2111_s4] sm:$0x3]  ;;  %s1010_s3 = scalar_lea.hbm (%p1917_p3), %s2160_s10, %s1347_s20  ;;  %s1636_s12 = scalar_lea.hbm (%p1917_p3), %s2160_s10, 32 }
  0xd3   : >> { %720 = vmatpush.bf16.msra.mxu3 %v1248_v36  ;;  %v367_v16 = vpack.c.bf16 %v351_v14, %v349_v13  ;;  %v2004_v18 = vperm.slane %v400_v17, 0  ;;  %v2007_v23 = vperm.slane %v400_v17, 1  ;;  %s1014_s16 = sshll.u32 (%p1917_p3), %s1010_s3, 4  ;;  %s2163_s17 = sand.u32 (%p1917_p3), 1, %s2161_s22   ;;  %s1015_s16 = int_to_ptr.hbm [resolvable:$true] %s1014_s16 }
  0xd4   : >> { %574 = vmatmul.bf16.vlgmr.msra.gmra.mxu0 %v352_v37  ;;  %s999_s30 = scalar_lea.sflag (%p1917_p3), [#allocation8], %s2163_s17  ;;  %s1630_s7 = sshra.s32 (%p1917_p3), %s1015_s16, 4  ;;  %s1631_s7 = int_to_ptr.hbm [resolvable:$true] %s1630_s7 }
  0xd5   : >> { %623 = vmatmul.bf16.vlgmr.msra.gmra.mxu1 %v353_v38  ;;  %672 = vmatmul.bf16.vlgmr.msra.gmra.mxu2 %v352_v37  ;;  %s1632_s6 = scalar_lea.hbm (%p1917_p3), %s1631_s7, 16  ;;  %p1637_p9 = scmp.lt.s32.totalorder (%p1917_p3), %s1631_s7, %s2160_s10 }
  0xd6   : >> { %721 = vmatmul.bf16.vlgmr.msra.gmra.mxu3 %v353_v38  ;;  %p1638_p10 = scmp.lt.s32.totalorder (%p1917_p3), %s1636_s12, %s1632_s6 }
  0xd8   : > { %p1639_p11 = por (%p1917_p3), %p1638_p10, %p1637_p9 }
  0xe4   : >> { %579 = vmatmul.bf16.gmra.mxu0 %v354_v43 }
  0xe5   : >> { %628 = vmatmul.bf16.gmra.mxu1 %v355_v44  ;;  %677 = vmatmul.bf16.gmra.mxu2 %v354_v43 }
  0xe6   : >> { %726 = vmatmul.bf16.gmra.mxu3 %v355_v44 }
  0xf4   : >> { %584 = vmatmul.bf16.gmra.mxu0 %v356_v49 }
  0xf5   : >> { %633 = vmatmul.bf16.gmra.mxu1 %v357_v50  ;;  %682 = vmatmul.bf16.gmra.mxu2 %v356_v49 }
  0xf6   : >> { %731 = vmatmul.bf16.gmra.mxu3 %v357_v50 }
 0x104   : >> { %589 = vmatmul.bf16.gmra.mxu0 %v358_v55 }
 0x105   : >> { %638 = vmatmul.bf16.gmra.mxu1 %v359_v56  ;;  %687 = vmatmul.bf16.gmra.mxu2 %v358_v55 }
 0x106   : >> { %736 = vmatmul.bf16.gmra.mxu3 %v359_v56 }
 0x114   : >> { %594 = vmatmul.bf16.gmra.mxu0 %v360_v61 }
 0x115   : >> { %643 = vmatmul.bf16.gmra.mxu1 %v361_v62  ;;  %692 = vmatmul.bf16.gmra.mxu2 %v360_v61 }
 0x116   : >> { %741 = vmatmul.bf16.gmra.mxu3 %v361_v62 }
 0x124   : >> { %599 = vmatmul.bf16.gmra.mxu0 %v362_v3 }
 0x125   : >> { %648 = vmatmul.bf16.gmra.mxu1 %v363_v4  ;;  %697 = vmatmul.bf16.gmra.mxu2 %v362_v3 }
 0x126   : >> { %746 = vmatmul.bf16.gmra.mxu3 %v363_v4 }
 0x134   : >> { %604 = vmatmul.bf16.gmra.mxu0 %v364_v9 }
 0x135   : >> { %653 = vmatmul.bf16.gmra.mxu1 %v365_v10  ;;  %702 = vmatmul.bf16.gmra.mxu2 %v364_v9 }
 0x136   : >> { %751 = vmatmul.bf16.gmra.mxu3 %v365_v10 }
 0x144   : >> { %609 = vmatmul.bf16.gmra.mxu0 %v366_v15 }
 0x145   : >> { %658 = vmatmul.bf16.gmra.mxu1 %v367_v16  ;;  %707 = vmatmul.bf16.gmra.mxu2 %v366_v15 }
 0x146   : >> { %756 = vmatmul.bf16.gmra.mxu3 %v367_v16 }
 0x151   : >> { %v575_v19 = vpop.f32.mrf.mxu0 }
 0x152   : >> { %v576_v20 = vadd.f32 %v575_v19, %v2004_v18  ;;  %v624_v21 = vpop.f32.mrf.mxu1 }
 0x154   : >> { %v625_v22 = vadd.f32 %v624_v21, %v576_v20 }
 0x156   : >> { %1455 = vtanh.f32 %v625_v22 }
 0x158   : >> { %v673_v24 = vpop.f32.mrf.mxu2 }
 0x159   : >> { %v674_v25 = vadd.f32 %v673_v24, %v2007_v23  ;;  %v722_v26 = vpop.f32.mrf.mxu3  ;;  %v577_v27 = vpop.f32.mrf.mxu0 }
 0x15a   : >> { %v578_v28 = vadd.f32 %v577_v27, %v2004_v18  ;;  %v626_v29 = vpop.f32.mrf.mxu1 }
 0x15b   : >> { %v723_v30 = vadd.f32 %v722_v26, %v674_v25 }
 0x15c   : >> { %v627_v31 = vadd.f32 %v626_v29, %v578_v28  ;;  %v1456_v38 = vpop.eup %1455 }
 0x15e   : >> { %1457 = vtanh.f32 %v627_v31 }
 0x15f   : >> { %1459 = vtanh.f32 %v723_v30 }
 0x160   : >> { %v675_v32 = vpop.f32.mrf.mxu2 }
 0x161   : >> { %v676_v33 = vadd.f32 %v675_v32, %v2007_v23  ;;  %v724_v34 = vpop.f32.mrf.mxu3  ;;  %v580_v35 = vpop.f32.mrf.mxu0 }
 0x162   : >> { %v581_v36 = vadd.f32 %v580_v35, %v2004_v18  ;;  %v629_v37 = vpop.f32.mrf.mxu1 }
 0x163   : >> { %v725_v39 = vadd.f32 %v724_v34, %v676_v33 }
 0x164   : >> { %v1458_v40 = vpop.eup %1457  ;;  %v630_v41 = vadd.f32 %v629_v37, %v581_v36 }
 0x165   : >> { %v796_v42 = vadd.f32 %v1458_v40, %v1456_v38  ;;  %1461 = vtanh.f32 %v725_v39  ;;  %v1460_v47 = vpop.eup %1459 }
 0x166   : >> { %1463 = vtanh.f32 %v630_v41 }
 0x167   : >> { %v797_v54 = vrot.slane %v796_v42, 4 }
 0x168   : >> { %v678_v43 = vpop.f32.mrf.mxu2 }
 0x169   : >> { %v679_v44 = vadd.f32 %v678_v43, %v2007_v23  ;;  %v727_v45 = vpop.f32.mrf.mxu3  ;;  %v582_v46 = vpop.f32.mrf.mxu0  ;;  %v798_v56 = vadd.f32 %v797_v54, %v796_v42 }
 0x16a   : >> { %v583_v48 = vadd.f32 %v582_v46, %v2004_v18  ;;  %v631_v49 = vpop.f32.mrf.mxu1 }
 0x16b   : >> { %v1462_v50 = vpop.eup %1461  ;;  %v728_v51 = vadd.f32 %v727_v45, %v679_v44  ;;  %v799_v3 = vrot.slane %v798_v56, 2 }
 0x16c   : >> { %v803_v52 = vadd.f32 %v1462_v50, %v1460_v47  ;;  %v632_v53 = vadd.f32 %v631_v49, %v583_v48  ;;  %v1464_v62 = vpop.eup %1463 }
 0x16d   : >> { %v800_v8 = vadd.f32 %v799_v3, %v798_v56 }
 0x16e   : >> { %1465 = vtanh.f32 %v632_v53  ;;  %v804_v1 = vrot.slane %v803_v52, 4 }
 0x16f   : >> { %1467 = vtanh.f32 %v728_v51  ;;  %v801_v24 = vrot.slane %v800_v8, 1 }
 0x170   : >> { %v680_v55 = vpop.f32.mrf.mxu2  ;;  %v805_v6 = vadd.f32 %v804_v1, %v803_v52 }
 0x171   : >> { %v681_v57 = vadd.f32 %v680_v55, %v2007_v23  ;;  %v729_v58 = vpop.f32.mrf.mxu3  ;;  %v585_v59 = vpop.f32.mrf.mxu0  ;;  %v802_v31 = vadd.f32 %v801_v24, %v800_v8 }
 0x172   : >> { %v586_v60 = vadd.f32 %v585_v59, %v2004_v18  ;;  %v634_v61 = vpop.f32.mrf.mxu1  ;;  %v806_v20 = vrot.slane %v805_v6, 2 }
 0x173   : >> { %v730_v63 = vadd.f32 %v729_v58, %v681_v57 }
 0x174   : >> { %v1466_v0 = vpop.eup %1465  ;;  %v635_v2 = vadd.f32 %v634_v61, %v586_v60  ;;  %v807_v28 = vadd.f32 %v806_v20, %v805_v6 }
 0x175   : >> { %v810_v4 = vadd.f32 %v1466_v0, %v1464_v62  ;;  %1469 = vtanh.f32 %v730_v63  ;;  %v1468_v13 = vpop.eup %1467 }
 0x176   : >> { %1471 = vtanh.f32 %v635_v2  ;;  %v808_v43 = vrot.slane %v807_v28, 1 }
 0x177   : >> { %v811_v5 = vrot.slane %v810_v4, 4 }
 0x178   : >> { %v683_v7 = vpop.f32.mrf.mxu2  ;;  %v809_v49 = vadd.f32 %v808_v43, %v807_v28 }
 0x179   : >> { %v812_v9 = vadd.f32 %v811_v5, %v810_v4  ;;  %v684_v10 = vadd.f32 %v683_v7, %v2007_v23  ;;  %v732_v11 = vpop.f32.mrf.mxu3  ;;  %v587_v12 = vpop.f32.mrf.mxu0 }
 0x17a   : >> { %v588_v14 = vadd.f32 %v587_v12, %v2004_v18  ;;  %v636_v15 = vpop.f32.mrf.mxu1 }
 0x17b   : >> { %v1470_v16 = vpop.eup %1469  ;;  %v813_v17 = vrot.slane %v812_v9, 2  ;;  %v733_v19 = vadd.f32 %v732_v11, %v684_v10 }
 0x17c   : >> { %v817_v21 = vadd.f32 %v1470_v16, %v1468_v13  ;;  %v637_v22 = vadd.f32 %v636_v15, %v588_v14  ;;  %v1472_v39 = vpop.eup %1471 }
 0x17d   : >> { %v814_v25 = vadd.f32 %v813_v17, %v812_v9 }
 0x17e   : >> { %v818_v26 = vrot.slane %v817_v21, 4  ;;  %1473 = vtanh.f32 %v637_v22 }
 0x17f   : >> { %v815_v27 = vrot.slane %v814_v25, 1  ;;  %1475 = vtanh.f32 %v733_v19 }
 0x180   : >> { %v819_v29 = vadd.f32 %v818_v26, %v817_v21  ;;  %v685_v30 = vpop.f32.mrf.mxu2 }
 0x181   : >> { %v816_v32 = vadd.f32 %v815_v27, %v814_v25  ;;  %v686_v33 = vadd.f32 %v685_v30, %v2007_v23  ;;  %v734_v34 = vpop.f32.mrf.mxu3  ;;  %v590_v35 = vpop.f32.mrf.mxu0 }
 0x182   : >> { %v820_v36 = vrot.slane %v819_v29, 2  ;;  %v591_v37 = vadd.f32 %v590_v35, %v2004_v18  ;;  %v639_v38 = vpop.f32.mrf.mxu1 }
 0x183   : >> { %v925_v40 = vsel %vm924_vm0, %v816_v32, %v802_v31  ;;  %v735_v41 = vadd.f32 %v734_v34, %v686_v33 }
 0x184   : >> { %v1474_v42 = vpop.eup %1473  ;;  %v821_v44 = vadd.f32 %v820_v36, %v819_v29  ;;  %v640_v45 = vadd.f32 %v639_v38, %v591_v37 }
 0x185   : >> { %v824_v46 = vadd.f32 %v1474_v42, %v1472_v39  ;;  %1477 = vtanh.f32 %v735_v41  ;;  %v1476_v56 = vpop.eup %1475 }
 0x186   : >> { %v822_v47 = vrot.slane %v821_v44, 1  ;;  %1479 = vtanh.f32 %v640_v45 }
 0x187   : >> { %v825_v48 = vrot.slane %v824_v46, 4 }
 0x188   : >> { %v823_v50 = vadd.f32 %v822_v47, %v821_v44  ;;  %v688_v51 = vpop.f32.mrf.mxu2 }
 0x189   : >> { %v826_v52 = vadd.f32 %v825_v48, %v824_v46  ;;  %v689_v53 = vadd.f32 %v688_v51, %v2007_v23  ;;  %v737_v54 = vpop.f32.mrf.mxu3  ;;  %v592_v55 = vpop.f32.mrf.mxu0 }
 0x18a   : >> { %v938_v57 = vsel %vm924_vm0, %v823_v50, %v809_v49  ;;  %v593_v58 = vadd.f32 %v592_v55, %v2004_v18  ;;  %v641_v59 = vpop.f32.mrf.mxu1 }
 0x18b   : >> { %v1478_v60 = vpop.eup %1477  ;;  %v827_v61 = vrot.slane %v826_v52, 2  ;;  %v738_v62 = vadd.f32 %v737_v54, %v689_v53 }
 0x18c   : >> { %v831_v63 = vadd.f32 %v1478_v60, %v1476_v56  ;;  %v642_v0 = vadd.f32 %v641_v59, %v593_v58  ;;  %v1480_v12 = vpop.eup %1479 }
 0x18d   : >> { %v828_v1 = vadd.f32 %v827_v61, %v826_v52 }
 0x18e   : >> { %v832_v2 = vrot.slane %v831_v63, 4  ;;  %1481 = vtanh.f32 %v642_v0 }
 0x18f   : >> { %v829_v3 = vrot.slane %v828_v1, 1  ;;  %1483 = vtanh.f32 %v738_v62 }
 0x190   : >> { %v833_v4 = vadd.f32 %v832_v2, %v831_v63  ;;  %v690_v5 = vpop.f32.mrf.mxu2 }
 0x191   : >> { %v830_v6 = vadd.f32 %v829_v3, %v828_v1  ;;  %v691_v7 = vadd.f32 %v690_v5, %v2007_v23  ;;  %v739_v8 = vpop.f32.mrf.mxu3  ;;  %v595_v9 = vpop.f32.mrf.mxu0 }
 0x192   : >> { %v834_v10 = vrot.slane %v833_v4, 2  ;;  %v644_v11 = vpop.f32.mrf.mxu1  ;;  %v596_v55 = vadd.f32 %v595_v9, %v2004_v18 }
 0x193   : >> { %v927_v13 = vsel %vm926_vm1, %v830_v6, %v925_v40  ;;  %v740_v14 = vadd.f32 %v739_v8, %v691_v7 }
 0x194   : >> { %v1482_v15 = vpop.eup %1481  ;;  %v835_v16 = vadd.f32 %v834_v10, %v833_v4  ;;  %v645_v60 = vadd.f32 %v644_v11, %v596_v55 }
 0x195   : >> { %v838_v17 = vadd.f32 %v1482_v15, %v1480_v12  ;;  %1485 = vtanh.f32 %v740_v14  ;;  %v1484_v27 = vpop.eup %1483 }
 0x196   : >> { %v836_v19 = vrot.slane %v835_v16, 1  ;;  %1487 = vtanh.f32 %v645_v60 }
 0x197   : >> { %v839_v20 = vrot.slane %v838_v17, 4 }
 0x198   : >> { %v837_v21 = vadd.f32 %v836_v19, %v835_v16  ;;  %v693_v22 = vpop.f32.mrf.mxu2 }
 0x199   : >> { %v840_v24 = vadd.f32 %v839_v20, %v838_v17  ;;  %v742_v25 = vpop.f32.mrf.mxu3  ;;  %v597_v26 = vpop.f32.mrf.mxu0  ;;  %v694_v1 = vadd.f32 %v693_v22, %v2007_v23 }
 0x19a   : >> { %v939_v28 = vsel %vm926_vm1, %v837_v21, %v938_v57  ;;  %v646_v29 = vpop.f32.mrf.mxu1  ;;  %v598_v57 = vadd.f32 %v597_v26, %v2004_v18 }
 0x19b   : >> { %v1486_v30 = vpop.eup %1485  ;;  %v841_v31 = vrot.slane %v840_v24, 2  ;;  %v743_v12 = vadd.f32 %v742_v25, %v694_v1 }
 0x19c   : >> { %v845_v32 = vadd.f32 %v1486_v30, %v1484_v27  ;;  %v647_v61 = vadd.f32 %v646_v29, %v598_v57  ;;  %v1488_v16 = vpop.eup %1487 }
 0x19d   : >> { %v842_v33 = vadd.f32 %v841_v31, %v840_v24 }
 0x19e   : >> { %v846_v34 = vrot.slane %v845_v32, 4  ;;  %1489 = vtanh.f32 %v647_v61 }
 0x19f   : >> { %v843_v35 = vrot.slane %v842_v33, 1 }
 0x1a0   : >> { %v847_v36 = vadd.f32 %v846_v34, %v845_v32  ;;  %v695_v37 = vpop.f32.mrf.mxu2 }
 0x1a1   : >> { %v844_v38 = vadd.f32 %v843_v35, %v842_v33  ;;  %v744_v39 = vpop.f32.mrf.mxu3  ;;  %v600_v40 = vpop.f32.mrf.mxu0  ;;  %v696_v5 = vadd.f32 %v695_v37, %v2007_v23 }
 0x1a2   : >> { %v848_v41 = vrot.slane %v847_v36, 2  ;;  %v649_v42 = vpop.f32.mrf.mxu1  ;;  %v601_v59 = vadd.f32 %v600_v40, %v2004_v18 }
 0x1a3   : >> { %v2028_v43 = vsel %vm928_vm2, %v844_v38, %v927_v13  ;;  %v745_v13 = vadd.f32 %v744_v39, %v696_v5 }
 0x1a4   : >> { %v849_v44 = vadd.f32 %v848_v41, %v847_v36  ;;  %v650_v2 = vadd.f32 %v649_v42, %v601_v59  ;;  %v1490_v20 = vpop.eup %1489 }
 0x1a5   : >> { %v852_v31 = vadd.f32 %v1490_v20, %v1488_v16 }
 0x1a6   : >> { %v850_v45 = vrot.slane %v849_v44, 1 }
 0x1a7   : >> { %v853_v38 = vrot.slane %v852_v31, 4 }
 0x1a8   : >> { %v851_v46 = vadd.f32 %v850_v45, %v849_v44  ;;  %v698_v47 = vpop.f32.mrf.mxu2 }
 0x1a9   : >> { %v747_v48 = vpop.f32.mrf.mxu3  ;;  %v602_v49 = vpop.f32.mrf.mxu0  ;;  %v699_v10 = vadd.f32 %v698_v47, %v2007_v23 }
 0x1aa   : >> { %v2030_v50 = vsel %vm928_vm2, %v851_v46, %v939_v28  ;;  %v651_v51 = vpop.f32.mrf.mxu1  ;;  %v603_v58 = vadd.f32 %v602_v49, %v2004_v18 }
 0x1ab   : >> { %v748_v17 = vadd.f32 %v747_v48, %v699_v10 }
 0x1ac   : >> { %v652_v63 = vadd.f32 %v651_v51, %v603_v58 }
 0x1ae   : >> { %1491 = vtanh.f32 %v652_v63 }
 0x1af   : >> { %1493 = vtanh.f32 %v650_v2 }
 0x1b0   : >> { %v700_v52 = vpop.f32.mrf.mxu2 }
 0x1b1   : >> { %v749_v53 = vpop.f32.mrf.mxu3  ;;  %v605_v54 = vpop.f32.mrf.mxu0  ;;  %v701_v8 = vadd.f32 %v700_v52, %v2007_v23 }
 0x1b2   : >> { %v654_v56 = vpop.f32.mrf.mxu1  ;;  %v606_v62 = vadd.f32 %v605_v54, %v2004_v18  ;;  %v854_v54 = vadd.f32 %v853_v38, %v852_v31 }
 0x1b3   : >> { %v750_v15 = vadd.f32 %v749_v53, %v701_v8 }
 0x1b4   : >> { %v655_v9 = vadd.f32 %v654_v56, %v606_v62  ;;  %v1492_v26 = vpop.eup %1491  ;;  %v855_v62 = vrot.slane %v854_v54, 2 }
 0x1b5   : >> { %v1494_v28 = vpop.eup %1493 }
 0x1b6   : >> { %v866_v33 = vadd.f32 %v1494_v28, %v1492_v26  ;;  %v856_v10 = vadd.f32 %v855_v62, %v854_v54 }
 0x1b8   : >> { %v703_v0 = vpop.f32.mrf.mxu2  ;;  %v867_v41 = vrot.slane %v866_v33, 4 }
 0x1b9   : >> { %v752_v3 = vpop.f32.mrf.mxu3  ;;  %v607_v4 = vpop.f32.mrf.mxu0  ;;  %v704_v14 = vadd.f32 %v703_v0, %v2007_v23 }
 0x1ba   : >> { %v608_v6 = vadd.f32 %v607_v4, %v2004_v18  ;;  %v656_v7 = vpop.f32.mrf.mxu1  ;;  %v868_v58 = vadd.f32 %v867_v41, %v866_v33 }
 0x1bb   : >> { %v753_v27 = vadd.f32 %v752_v3, %v704_v14 }
 0x1bc   : >> { %v657_v11 = vadd.f32 %v656_v7, %v608_v6 }
 0x1be   : >> { %1495 = vtanh.f32 %v657_v11 }
 0x1bf   : >> { %1497 = vtanh.f32 %v655_v9 }
 0x1c0   : >> { %v705_v19 = vpop.f32.mrf.mxu2  ;;  %1499 = vtanh.f32 %v743_v12 }
 0x1c1   : >> { %v706_v21 = vadd.f32 %v705_v19, %v2007_v23  ;;  %v754_v22 = vpop.f32.mrf.mxu3  ;;  %v610_v24 = vpop.f32.mrf.mxu0  ;;  %1501 = vtanh.f32 %v745_v13  ;;  %v857_v19 = vrot.slane %v856_v10, 1 }
 0x1c2   : >> { %v659_v25 = vpop.f32.mrf.mxu1  ;;  %1503 = vtanh.f32 %v750_v15  ;;  %v611_v34 = vadd.f32 %v610_v24, %v2004_v18 }
 0x1c3   : >> { %v755_v29 = vadd.f32 %v754_v22, %v706_v21  ;;  %1505 = vtanh.f32 %v748_v17 }
 0x1c4   : >> { %v1496_v30 = vpop.eup %1495  ;;  %v660_v42 = vadd.f32 %v659_v25, %v611_v34 }
 0x1c5   : >> { %v1498_v32 = vpop.eup %1497  ;;  %1507 = vtanh.f32 %v755_v29  ;;  %v858_v29 = vadd.f32 %v857_v19, %v856_v10 }
 0x1c6   : >> { %1509 = vtanh.f32 %v753_v27  ;;  %v880_v35 = vadd.f32 %v1498_v32, %v1496_v30  ;;  %v1500_v36 = vpop.eup %1499 }
 0x1c7   : >> { %v1502_v37 = vpop.eup %1501  ;;  %1511 = vtanh.f32 %v660_v42 }
 0x1c8   : >> { %v708_v39 = vpop.f32.mrf.mxu2  ;;  %v1504_v40 = vpop.eup %1503  ;;  %v881_v47 = vrot.slane %v880_v35, 4  ;;  %v859_v51 = vadd.f32 %v1502_v37, %v1500_v36 }
 0x1c9   : >> { %v757_v44 = vpop.f32.mrf.mxu3  ;;  %v612_v45 = vpop.f32.mrf.mxu0  ;;  %v709_v56 = vadd.f32 %v708_v39, %v2007_v23  ;;  %v931_v39 = vsel %vm930_vm3, %v858_v29, %v2028_v43 }
 0x1ca   : >> { %v1506_v46 = vpop.eup %1505  ;;  %v613_v48 = vadd.f32 %v612_v45, %v2004_v18  ;;  %v661_v52 = vpop.f32.mrf.mxu1  ;;  %v882_v60 = vadd.f32 %v881_v47, %v880_v35  ;;  %v860_v61 = vrot.slane %v859_v51, 4  ;;  %v869_v18 = vrot.slane %v868_v58, 2  ;;  %v794_v45 = vld [vmem:[%s1843_s18] sm:$0xff] }
 0x1cb   : >> { %v1508_v49 = vpop.eup %1507  ;;  %v873_v55 = vadd.f32 %v1506_v46, %v1504_v40  ;;  %v758_v0 = vadd.f32 %v757_v44, %v709_v56 }
 0x1cc   : >> { %v1510_v53 = vpop.eup %1509  ;;  %v662_v57 = vadd.f32 %v661_v52, %v613_v48  ;;  %v883_v4 = vrot.slane %v882_v60, 2  ;;  %v861_v7 = vadd.f32 %v860_v61, %v859_v51  ;;  %v870_v12 = vadd.f32 %v869_v18, %v868_v58  ;;  %v795_v58 = vld [vmem:[%s1843_s18 + $0x8] sm:$0xff] }
 0x1cd   : >> { %v887_v59 = vadd.f32 %v1510_v53, %v1508_v49  ;;  %v874_v63 = vrot.slane %v873_v55, 4  ;;  %v1512_v6 = vpop.eup %1511 }
 0x1ce   : >> { %1513 = vtanh.f32 %v662_v57  ;;  %v884_v15 = vadd.f32 %v883_v4, %v882_v60  ;;  %v862_v16 = vrot.slane %v861_v7, 2  ;;  %v871_v21 = vrot.slane %v870_v12, 1 }
 0x1cf   : >> { %v888_v2 = vrot.slane %v887_v59, 4  ;;  %v875_v11 = vadd.f32 %v874_v63, %v873_v55  ;;  %1515 = vtanh.f32 %v758_v0  ;;  %v1746_v63 = vmov (%p1917_p3), 0  }
 0x1d0   : >> { %v710_v1 = vpop.f32.mrf.mxu2  ;;  %v885_v26 = vrot.slane %v884_v15, 1  ;;  %v863_v25 = vadd.f32 %v862_v16, %v861_v7  ;;  %v872_v32 = vadd.f32 %v871_v21, %v870_v12  ;;  %1519 = vset.pattern.permute.xlu0 (%p1917_p3), %v1746_v63 }
 0x1d1   : >> { %v711_v3 = vadd.f32 %v710_v1, %v2007_v23  ;;  %v759_v5 = vpop.f32.mrf.mxu3  ;;  %v889_v13 = vadd.f32 %v888_v2, %v887_v59  ;;  %v876_v20 = vrot.slane %v875_v11, 2 }
 0x1d2   : >> { %v886_v35 = vadd.f32 %v885_v26, %v884_v15  ;;  %v864_v37 = vrot.slane %v863_v25, 1  ;;  %v933_v42 = vsel %vm932_vm4, %v872_v32, %v931_v39 }
 0x1d3   : >> { %v760_v8 = vadd.f32 %v759_v5, %v711_v3  ;;  %v890_v23 = vrot.slane %v889_v13, 2  ;;  %v877_v30 = vadd.f32 %v876_v20, %v875_v11 }
 0x1d4   : >> { %v1514_v9 = vpop.eup %1513  ;;  %v935_v47 = vsel %vm934_vm5, %v886_v35, %v933_v42  ;;  %v865_v49 = vadd.f32 %v864_v37, %v863_v25 }
 0x1d5   : >> { %v894_v14 = vadd.f32 %v1514_v9, %v1512_v6  ;;  %1517 = vtanh.f32 %v760_v8  ;;  %v1516_v24 = vpop.eup %1515  ;;  %v891_v33 = vadd.f32 %v890_v23, %v889_v13  ;;  %v878_v40 = vrot.slane %v877_v30, 1 }
 0x1d6   : >> { %v941_v56 = vsel %vm930_vm3, %v865_v49, %v2030_v50  ;;  %v951_v50 = vld [vmem:[%s2158_s29] sm:$0xff] (%p1917_p3) }
 0x1d7   : >> { %v895_v17 = vrot.slane %v894_v14, 4  ;;  %v892_v44 = vrot.slane %v891_v33, 1  ;;  %v879_v52 = vadd.f32 %v878_v40, %v877_v30  ;;  %1520 = vrcp.f32 (%p1917_p3), %v951_v50 }
 0x1d9   : >> { %v896_v22 = vadd.f32 %v895_v17, %v894_v14  ;;  %v893_v54 = vadd.f32 %v892_v44, %v891_v33  ;;  %v942_v57 = vsel %vm932_vm4, %v879_v52, %v941_v56 }
 0x1db   : >> { %v1518_v27 = vpop.eup %1517  ;;  %v897_v28 = vrot.slane %v896_v22, 2  ;;  %v943_v60 = vsel %vm934_vm5, %v893_v54, %v942_v57 }
 0x1dc   : >> { %v901_v31 = vadd.f32 %v1518_v27, %v1516_v24 }
 0x1dd   : >> { %v898_v34 = vadd.f32 %v897_v28, %v896_v22  ;;  %v1521_v0 = vpop.eup (%p1917_p3), %1520 }
 0x1de   : >> { %v902_v36 = vrot.slane %v901_v31, 4  ;;  %957 = vperm.xlu0 (%p1917_p3), %1519, %v1521_v0  }
 0x1df   : >> { %v899_v38 = vrot.slane %v898_v34, 1 }
 0x1e0   : >> { %v903_v41 = vadd.f32 %v902_v36, %v901_v31 }
 0x1e1   : >> { %v900_v46 = vadd.f32 %v899_v38, %v898_v34 }
 0x1e2   : >> { %v904_v48 = vrot.slane %v903_v41, 2 }
 0x1e3   : >> { %v937_v51 = vsel %vm936_vm6, %v900_v46, %v935_v47 }
 0x1e4   : >> { %v947_v53 = vadd.f32 %v937_v51, %v794_v45  ;;  %v905_v43 = vadd.f32 %v904_v48, %v903_v41 }
 0x1e6   : >> { %949 = vst [vmem:[%s1843_s18] sm:$0xff] %v947_v53  ;;  %v906_v55 = vrot.slane %v905_v43, 1 }
 0x1e8   : >> { %v907_v59 = vadd.f32 %v906_v55, %v905_v43 }
 0x1e9   : > { %241 = sbr.rel (!%p1917_p3) target bundleno = 96 (0x60), region = 181 }
 0x1ea   : >> { %v944_v61 = vsel %vm936_vm6, %v907_v59, %v943_v60 }
 0x1eb   : >> { %v948_v62 = vadd.f32 %v944_v61, %v795_v58 }
 0x1ed   : >> { %950 = vst [vmem:[%s1843_s18 + $0x8] sm:$0xff] %v948_v62  ;;  %v953_v1 = vld [vmem:[%s1843_s18] sm:$0xff] (%p1917_p3)  ;;  %p1633_p3 = scmp.ne.s32.totalorder (%p1917_p3), %s1631_s7, %s1632_s6 }
 0x1ef   : > { %p1634_p7 = pnand %p1633_p3, %p1818_p5 }
 0x1f1   : > { %p1635_p8 = pneg %p1634_p7 }
 0x1f3   : > { %p1640_p12 = pnand %p1639_p11, %p1635_p8 }
 0x1f4   : > { %v954_v18 = vld [vmem:[%s1843_s18 + $0x8] sm:$0xff] }
 0x250   : > { %v958_v2 = vpop.permute.xlu0 %957 }
 0x251   : > { %v960_v3 = vmul.f32 %v958_v2, %v953_v1  ;;  %v961_v4 = vmul.f32 %v958_v2, %v954_v18 }
 0x253   : > { %v962_v5 = vmul.f32 %v960_v3, %v960_v3  ;;  %v963_v6 = vmul.f32 %v961_v4, %v961_v4 }
 0x255   : > { %v964_v7 = vadd.f32 %v963_v6, %v962_v5 }
 0x257   : > { %965 = vadd.xlane.f32.xlu0 %v964_v7 }
 0x2ca   : > { %v966_v8 = vpop.xlane.xlu0 %965 }
 0x2cb   : > { %1522 = vrsqrt.f32 %v966_v8  ;;  %vm974_vm7 = vcmp.eq.f32.partialorder %v966_v8, inf  ;;  %v977_v16 = vand.u32 2147483648, %v966_v8  ;;  %vm976_vm8 = vcmp.eq.f32.partialorder %v966_v8, 0.0 }
 0x2d1   : > { %v1523_v9 = vpop.eup %1522 }
 0x2d2   : > { %v968_v10 = vmul.f32 %v1523_v9, %v966_v8 }
 0x2d4   : > { %v969_v11 = vmul.f32 %v1523_v9, %v968_v10 }
 0x2d6   : > { %v970_v12 = vmul.f32 0.5, %v969_v11 }
 0x2d8   : > { %v971_v13 = vsub.f32 1.5, %v970_v12 }
 0x2da   : > { %v972_v14 = vmul.f32 %v1523_v9, %v971_v13 }
 0x2dc   : > { %v973_v15 = vmul.f32 %v972_v14, %v966_v8 }
 0x2de   : > { %v975_v17 = vsel %vm974_vm7, %v966_v8, %v973_v15 }
 0x2df   : > { %v978_v19 = vsel %vm976_vm8, %v977_v16, %v975_v17 }
 0x2e0   : > { %v979_v20 = vmax.f32 %v978_v19, 1e-12 }
 0x2e2   : > { %1524 = vrcp.f32 %v979_v20  ;;  %v991_v24 = vand.u32 2147483648, %v979_v20  ;;  %v989_v27 = vand.u32 2147483647, %v979_v20  ;;  %vm985_vm10 = vweird.f32 %v979_v20 }
 0x2e4   : > { %v992_v28 = vor.u32 1.1754944e-38, %v991_v24  ;;  %vm990_vm12 = vcmp.eq.f32.partialorder %v989_v27, 8.507059e+37 }
 0x2e8   : > { %v1525_v21 = vpop.eup %1524 }
 0x2e9   : > { %v981_v23 = vmul.f32 %v1525_v21, %v979_v20  ;;  %vm986_vm9 = vweird.f32 %v1525_v21 }
 0x2ea   : > { %vm987_vm11 = vmor %vm985_vm10, %vm986_vm9 }
 0x2eb   : > { %v982_v22 = vsub.f32 1.0, %v981_v23 }
 0x2ed   : > { %v983_v26 = vmul.f32 %v1525_v21, %v982_v22 }
 0x2ef   : > { %v984_v25 = vadd.f32 %v1525_v21, %v983_v26 }
 0x2f1   : > { %v988_v29 = vsel %vm987_vm11, %v1525_v21, %v984_v25 }
 0x2f2   : > { %v993_v30 = vsel %vm990_vm12, %v992_v28, %v988_v29 }
 0x2f3   : > { %v994_v31 = vmul.f32 %v993_v30, %v960_v3  ;;  %v995_v32 = vmul.f32 %v993_v30, %v961_v4 }
 0x2f5   : > { %996 = vst [vmem:[%s1843_s18] sm:$0xff] %v994_v31 }
 0x2f6   : > { %997 = vst [vmem:[%s1843_s18 + $0x8] sm:$0xff] %v995_v32 }
 0x2f7   : > { %1643 = shalt.err (!%p1640_p12)
}
 0x2f8   : > { %1352 = dma.vmem_to_hbm [thread:$0]  (%p1818_p5), %s1013_s25, 256, %s1015_s16, %s999_s30  }
 0x2f9 PF: > { %s2164_s18 = sld [smem:[#allocation19_spill]] }
 0x2fa   : > { %s2165_s11 = sld [smem:[#allocation16_spill]] }
 0x2ff   : > { %p1364_p13 = scmp.ge.s32.totalorder %s2164_s18, 2 }
 0x300   : > { %s1026_s13 = sand.u32 1, %s2165_s11  }
 0x301   : > { %p1359_p0 = pnand %p1364_p13, %p1822_p6  ;;  %s1027_s0 = scalar_lea.sflag [#allocation8], %s1026_s13 }
 0x303   : > { %p1360_p1 = pneg %p1359_p0 }
 0x305   : > { %1693 = dma.done.wait (%p1360_p1), %s1027_s0, 256  }
 0x306   : > { %1695 = vsyncadd (%p1360_p1), %s1027_s0, 4294967040  ;;  %s2167_s25 = sld [smem:[#allocation21_spill]] }
 0x307   : > { %s2168_s22 = sld [smem:[#allocation17_spill]] }
 0x308   : > { %s2169_s23 = sld [smem:[#allocation18_spill]] }
 0x309   : > { %s2170_s24 = sld [smem:[#allocation22_spill]] }
 0x30c   : > { %p24_p2 = scmp.ge.s32.totalorder %s2167_s25, 4  }
 0x30e   :  { %26 = sbr.rel (!%p24_p2) target bundleno = 12 (0xc), region = 192 }
 0x313   :  { %1033 = vsyncpa [#allocation7], 1 }
 0x314   :  { %1035 = vsyncpa [#allocation7 + $0x1], 1 }
 0x315   :  { %1036 = vsyncpa [#allocation8], 1 }
 0x316   :  { %1038 = vsyncpa [#allocation8 + $0x1], 1 }
 0x317   :  { %1039 = vsyncmov [#allocation3] }
 0x31a   :  { %s1040_s9 = vpop.sfrf %1039 }
 0x31b   :  { %p1310_p5 = scmp.ne.s32.totalorder %s1040_s9, 0 }
 0x31d   :  { %1044 = shalt.err (%p1310_p5)  }
 0x31e   :  { %1046 = vsyncmov [#allocation3 + $0x1] }
 0x321   :  { %s1047_s2 = vpop.sfrf %1046 }
 0x322   :  { %p1311_p6 = scmp.ne.s32.totalorder %s1047_s2, 0 }
 0x324   :  { %1051 = shalt.err (%p1311_p6)  }

</bundles_post_ra>
